<compile_context>
chip_gen: v7x
topology: tpu7x:2x2x1
jax: 0.10.0
libtpu: 0.0.40
codegen_flags: <defaults>
</compile_context>

<pallas_src>
import functools

import jax
import jax.numpy as jnp
from jax.experimental import pallas as pl
from jax.experimental.pallas import tpu as pltpu

DROPOUT_P = 0.2


def _hash_u32(x):
    # murmur3-style 32-bit finalizer; pure VPU work (no pltpu PRNG needed).
    x = x ^ (x >> 16)
    x = x * jnp.uint32(0x7FEB352D)
    x = x ^ (x >> 15)
    x = x * jnp.uint32(0x846CA68B)
    x = x ^ (x >> 16)
    return x


def ffn_kernel(seed_ref, x_ref, w1_ref, b1_ref, w2_ref, b2_ref, o_ref, h_ref,
               *, apply_dropout, keep_prob):
    # Linear 1: bf16 MXU inputs, f32 accumulation; bias + ReLU in f32.
    xb = x_ref[...].astype(jnp.bfloat16)
    h = jnp.dot(xb, w1_ref[...], preferred_element_type=jnp.float32)
    # Stage the (tm, H) intermediate in VMEM scratch to bound vreg pressure.
    h_ref[...] = jnp.maximum(h + b1_ref[...], 0.0)

    # Linear 2: bf16 MXU inputs, f32 accumulation; bias in f32.
    y = jnp.dot(h_ref[...].astype(jnp.bfloat16), w2_ref[...],
                preferred_element_type=jnp.float32)
    y = y + b2_ref[...]

    if apply_dropout:
        tm, C = o_ref.shape
        # Globally unique per-element counter -> uncorrelated masks across tiles.
        row0 = (pl.program_id(0) * tm).astype(jnp.uint32)
        rows = jax.lax.broadcasted_iota(jnp.uint32, (tm, C), 0) + row0
        cols = jax.lax.broadcasted_iota(jnp.uint32, (tm, C), 1)
        ctr = rows * jnp.uint32(C) + cols
        s = seed_ref[0].astype(jnp.uint32) * jnp.uint32(0x9E3779B1)
        bits = _hash_u32(ctr ^ s)
        thresh = jnp.uint32(min(int(round(keep_prob * (2 ** 32))), 2 ** 32 - 1))
        keep = bits < thresh
        y = jnp.where(keep, y * jnp.float32(1.0 / keep_prob), jnp.float32(0.0))

    o_ref[...] = y.astype(o_ref.dtype)


def feedforward(x, w1, b1, w2, b2, seed, *, p=DROPOUT_P, training=True, tm=256):
    """x: (B, T, C) float32.  w1: (C, H), b1: (1, H), w2: (H, C), b2: (1, C)."""
    B, T, C = x.shape
    H = w1.shape[1]
    M = B * T
    x2 = x.reshape(M, C)

    # Pick a big, MXU/DMA-friendly row tile that divides M (sublane-aligned).
    tm = min(tm, M)
    while M % tm != 0:
        tm //= 2
    assert tm == M or tm % 8 == 0, f"row tile {tm} not sublane aligned"

    apply_dropout = bool(training) and float(p) > 0.0
    keep_prob = 1.0 - float(p)

    # bf16 weights: MXU-native inputs, half the weight HBM/VMEM footprint.
    w1b = w1.astype(jnp.bfloat16)
    w2b = w2.astype(jnp.bfloat16)
    b1f = b1.astype(jnp.float32)
    b2f = b2.astype(jnp.float32)

    # Explicit VMEM budget: BlockSpec double-buffers every operand even with a
    # constant index_map, plus the h scratch.  Clamp to [32 MiB, 64 MiB] so it
    # is safe on v7x (64 MiB physical) while letting v5e/v6e use larger tiles.
    vmem_bytes = (2 * 2 * (C * H + H * C)      # bf16 weights, 2 buffers each
                  + 2 * tm * C * 4 * 2         # x tile + out tile (f32), 2 buffers
                  + tm * H * 4                 # h scratch
                  + 2 * (H + C) * 4 * 2        # biases
                  + (4 << 20))                 # headroom
    vmem_limit = int(min(max(vmem_bytes, 32 << 20), 64 << 20))

    kernel = functools.partial(ffn_kernel,
                               apply_dropout=apply_dropout,
                               keep_prob=keep_prob)

    out = pl.pallas_call(
        kernel,
        out_shape=jax.ShapeDtypeStruct((M, C), x.dtype),
        grid_spec=pltpu.PrefetchScalarGridSpec(
            num_scalar_prefetch=1,
            grid=(M // tm,),
            in_specs=[
                pl.BlockSpec((tm, C), lambda i, seed_ref: (i, 0)),   # x row tile
                pl.BlockSpec((C, H), lambda i, seed_ref: (0, 0)),    # w1 (bf16, resident)
                pl.BlockSpec((1, H), lambda i, seed_ref: (0, 0)),    # b1
                pl.BlockSpec((H, C), lambda i, seed_ref: (0, 0)),    # w2 (bf16, resident)
                pl.BlockSpec((1, C), lambda i, seed_ref: (0, 0)),    # b2
            ],
            out_specs=pl.BlockSpec((tm, C), lambda i, seed_ref: (i, 0)),
            scratch_shapes=[pltpu.VMEM((tm, H), jnp.float32)],
        ),
        compiler_params=pltpu.CompilerParams(
            dimension_semantics=("parallel",),
            vmem_limit_bytes=vmem_limit),
    )(jnp.asarray([seed], jnp.int32), x2, w1b, b1f, w2b, b2f)
    return out.reshape(B, T, C)


def init_params(key, n_embd):
    """Deterministic init mimicking nn.Linear: U(-1/sqrt(fan_in), 1/sqrt(fan_in))."""
    hidden = 4 * n_embd
    k1, k2, k3, k4 = jax.random.split(key, 4)
    lim1 = 1.0 / jnp.sqrt(n_embd)
    lim2 = 1.0 / jnp.sqrt(hidden)
    w1 = jax.random.uniform(k1, (n_embd, hidden), jnp.float32, -lim1, lim1)
    b1 = jax.random.uniform(k2, (1, hidden), jnp.float32, -lim1, lim1)
    w2 = jax.random.uniform(k3, (hidden, n_embd), jnp.float32, -lim2, lim2)
    b2 = jax.random.uniform(k4, (1, n_embd), jnp.float32, -lim2, lim2)
    return w1, b1, w2, b2


if __name__ == "__main__":
    # Small shapes consistent with the module (B, T, n_embd); n_embd scaled
    # down from 384 -> 128 to stay small and lane-aligned; T=256 so the grid
    # has multiple row tiles (exercises the per-tile dropout offsets).
    B, T, n_embd = 2, 256, 128
    key = jax.random.PRNGKey(0)
    kx, kp = jax.random.split(key)
    x = jax.random.normal(kx, (B, T, n_embd), jnp.float32)
    w1, b1, w2, b2 = init_params(kp, n_embd)

    # Training path (dropout on).
    y_train = feedforward(x, w1, b1, w2, b2, seed=1234, training=True)
    jax.block_until_ready(y_train)
    assert y_train.shape == (B, T, n_embd)

    # Eval path (dropout off): check against a pure-JAX reference
    # (loose tolerance due to bf16 matmul inputs).
    y_eval = feedforward(x, w1, b1, w2, b2, seed=0, training=False)
    jax.block_until_ready(y_eval)
    ref = jnp.maximum(x.reshape(-1, n_embd) @ w1 + b1, 0.0) @ w2 + b2
    ref = ref.reshape(B, T, n_embd)
    err = float(jnp.max(jnp.abs(y_eval - ref)))
    assert err < 5e-2, f"max abs err {err}"

    print("KERNEL_OK")
</pallas_src>

<mosaic_0001>
module attributes {stable_mosaic.version = 11 : i64} {
  func.func @ffn_kernel(%arg0: i32, %arg1: memref<1xi32, #tpu.memory_space<smem>>, %arg2: memref<256x128xf32, #tpu.memory_space<vmem>>, %arg3: memref<128x512xbf16, #tpu.memory_space<vmem>>, %arg4: memref<1x512xf32, #tpu.memory_space<vmem>>, %arg5: memref<512x128xbf16, #tpu.memory_space<vmem>>, %arg6: memref<1x128xf32, #tpu.memory_space<vmem>>, %arg7: memref<256x128xf32, #tpu.memory_space<vmem>>, %arg8: memref<256x512xf32, #tpu.memory_space<vmem>>) attributes {dimension_semantics = [#tpu.dimension_semantics<parallel>], iteration_bounds = array<i64: 2>, scalar_prefetch = 1 : i64, scratch_operands = 1 : i64, tpu.core_type = #tpu.core_type<tc>, window_params = [{transform_indices = @transform_0, window_bounds = array<i64: 256, 128>}, {pipeline_mode = #tpu.pipeline_mode<synchronous>, transform_indices = @transform_1, window_bounds = array<i64: 128, 512>}, {pipeline_mode = #tpu.pipeline_mode<synchronous>, transform_indices = @transform_2, window_bounds = array<i64: 1, 512>}, {pipeline_mode = #tpu.pipeline_mode<synchronous>, transform_indices = @transform_3, window_bounds = array<i64: 512, 128>}, {pipeline_mode = #tpu.pipeline_mode<synchronous>, transform_indices = @transform_4, window_bounds = array<i64: 1, 128>}, {transform_indices = @transform_5, window_bounds = array<i64: 256, 128>}]} {
    %c0 = arith.constant 0 : index
    %c0_0 = arith.constant 0 : index
    %0 = vector.load %arg2[%c0, %c0_0] : memref<256x128xf32, #tpu.memory_space<vmem>>, vector<256x128xf32>
    %1 = arith.truncf %0 : vector<256x128xf32> to vector<256x128xbf16>
    %c0_1 = arith.constant 0 : index
    %c0_2 = arith.constant 0 : index
    %2 = vector.load %arg3[%c0_1, %c0_2] : memref<128x512xbf16, #tpu.memory_space<vmem>>, vector<128x512xbf16>
    %cst = arith.constant dense<0.000000e+00> : vector<256x512xf32>
    %3 = tpu.matmul %1, %2, %cst {dimension_numbers = #tpu.dot_dimension_numbers<[1], [0], [0], [1], [0, 0, 1, 1], [], []>} : vector<256x128xbf16>, vector<128x512xbf16>, vector<256x512xf32> -> vector<256x512xf32>
    %c0_3 = arith.constant 0 : index
    %c0_4 = arith.constant 0 : index
    %4 = vector.load %arg4[%c0_3, %c0_4] : memref<1x512xf32, #tpu.memory_space<vmem>>, vector<1x512xf32>
    %5 = vector.broadcast %4 : vector<1x512xf32> to vector<256x512xf32>
    %6 = arith.addf %3, %5 : vector<256x512xf32>
    %cst_5 = arith.constant 0.000000e+00 : f32
    %7 = vector.broadcast %cst_5 : f32 to vector<256x512xf32>
    %8 = arith.maximumf %6, %7 : vector<256x512xf32>
    %c0_6 = arith.constant 0 : index
    %c0_7 = arith.constant 0 : index
    %9 = vector.load %arg8[%c0_6, %c0_7] : memref<256x512xf32, #tpu.memory_space<vmem>>, vector<256x512xf32>
    tpu.vector_store %arg8[%c0_6, %c0_7], %8 {strides = array<i32>} : memref<256x512xf32, #tpu.memory_space<vmem>>, vector<256x512xf32>,
    %c0_8 = arith.constant 0 : index
    %c0_9 = arith.constant 0 : index
    %10 = vector.load %arg8[%c0_8, %c0_9] : memref<256x512xf32, #tpu.memory_space<vmem>>, vector<256x512xf32>
    %11 = arith.truncf %10 : vector<256x512xf32> to vector<256x512xbf16>
    %c0_10 = arith.constant 0 : index
    %c0_11 = arith.constant 0 : index
    %12 = vector.load %arg5[%c0_10, %c0_11] : memref<512x128xbf16, #tpu.memory_space<vmem>>, vector<512x128xbf16>
    %cst_12 = arith.constant dense<0.000000e+00> : vector<256x128xf32>
    %13 = tpu.matmul %11, %12, %cst_12 {dimension_numbers = #tpu.dot_dimension_numbers<[1], [0], [0], [1], [0, 0, 1, 1], [], []>} : vector<256x512xbf16>, vector<512x128xbf16>, vector<256x128xf32> -> vector<256x128xf32>
    %c0_13 = arith.constant 0 : index
    %c0_14 = arith.constant 0 : index
    %14 = vector.load %arg6[%c0_13, %c0_14] : memref<1x128xf32, #tpu.memory_space<vmem>>, vector<1x128xf32>
    %15 = vector.broadcast %14 : vector<1x128xf32> to vector<256x128xf32>
    %16 = arith.addf %13, %15 : vector<256x128xf32>
    %c256_i32 = arith.constant 256 : i32
    %17 = arith.muli %arg0, %c256_i32 : i32
    %18 = tpu.iota {dimensions = array<i32: 0>} : vector<256x128xi32>
    %19 = vector.broadcast %17 : i32 to vector<256x128xi32>
    %20 = arith.addi %18, %19 : vector<256x128xi32>
    %21 = tpu.iota {dimensions = array<i32: 1>} : vector<256x128xi32>
    %c128_i32 = arith.constant 128 : i32
    %22 = vector.broadcast %c128_i32 : i32 to vector<256x128xi32>
    %23 = arith.muli %20, %22 : vector<256x128xi32>
    %24 = arith.addi %23, %21 : vector<256x128xi32>
    %c0_15 = arith.constant 0 : index
    %25 = memref.load %arg1[%c0_15] : memref<1xi32, #tpu.memory_space<smem>>
    %c-1640531535_i32 = arith.constant -1640531535 : i32
    %26 = arith.muli %25, %c-1640531535_i32 : i32
    %27 = vector.broadcast %26 : i32 to vector<256x128xi32>
    %28 = arith.xori %24, %27 : vector<256x128xi32>
    %c16_i32 = arith.constant 16 : i32
    %29 = vector.broadcast %c16_i32 : i32 to vector<256x128xi32>
    %30 = arith.shrui %28, %29 : vector<256x128xi32>
    %31 = arith.xori %28, %30 : vector<256x128xi32>
    %c2146121005_i32 = arith.constant 2146121005 : i32
    %32 = vector.broadcast %c2146121005_i32 : i32 to vector<256x128xi32>
    %33 = arith.muli %31, %32 : vector<256x128xi32>
    %c15_i32 = arith.constant 15 : i32
    %34 = vector.broadcast %c15_i32 : i32 to vector<256x128xi32>
    %35 = arith.shrui %33, %34 : vector<256x128xi32>
    %36 = arith.xori %33, %35 : vector<256x128xi32>
    %c-2073254261_i32 = arith.constant -2073254261 : i32
    %37 = vector.broadcast %c-2073254261_i32 : i32 to vector<256x128xi32>
    %38 = arith.muli %36, %37 : vector<256x128xi32>
    %c16_i32_16 = arith.constant 16 : i32
    %39 = vector.broadcast %c16_i32_16 : i32 to vector<256x128xi32>
    %40 = arith.shrui %38, %39 : vector<256x128xi32>
    %41 = arith.xori %38, %40 : vector<256x128xi32>
    %c-858993459_i32 = arith.constant -858993459 : i32
    %42 = vector.broadcast %c-858993459_i32 : i32 to vector<256x128xi32>
    %43 = arith.cmpi ult, %41, %42 : vector<256x128xi32>
    %cst_17 = arith.constant 1.250000e+00 : f32
    %44 = vector.broadcast %cst_17 : f32 to vector<256x128xf32>
    %45 = arith.mulf %16, %44 : vector<256x128xf32>
    %cst_18 = arith.constant 0.000000e+00 : f32
    %46 = vector.broadcast %cst_18 : f32 to vector<256x128xf32>
    %47 = arith.select %43, %45, %46 : vector<256x128xi1>, vector<256x128xf32>
    %c0_19 = arith.constant 0 : index
    %c0_20 = arith.constant 0 : index
    %48 = vector.load %arg7[%c0_19, %c0_20] : memref<256x128xf32, #tpu.memory_space<vmem>>, vector<256x128xf32>
    tpu.vector_store %arg7[%c0_19, %c0_20], %47 {strides = array<i32>} : memref<256x128xf32, #tpu.memory_space<vmem>>, vector<256x128xf32>,
    return
  }
  func.func @transform_0(%arg0: i32, %arg1: memref<1xi32, #tpu.memory_space<smem>>) -> (i32, i32) {
    %c0_i32 = arith.constant 0 : i32
    %c0_i32_0 = arith.constant 0 : i32
    return %arg0, %c0_i32 : i32, i32
  }
  func.func @transform_1(%arg0: i32, %arg1: memref<1xi32, #tpu.memory_space<smem>>) -> (i32, i32) {
    %c0_i32 = arith.constant 0 : i32
    %c0_i32_0 = arith.constant 0 : i32
    %c0_i32_1 = arith.constant 0 : i32
    return %c0_i32, %c0_i32_0 : i32, i32
  }
  func.func @transform_2(%arg0: i32, %arg1: memref<1xi32, #tpu.memory_space<smem>>) -> (i32, i32) {
    %c0_i32 = arith.constant 0 : i32
    %c0_i32_0 = arith.constant 0 : i32
    %c0_i32_1 = arith.constant 0 : i32
    return %c0_i32, %c0_i32_0 : i32, i32
  }
  func.func @transform_3(%arg0: i32, %arg1: memref<1xi32, #tpu.memory_space<smem>>) -> (i32, i32) {
    %c0_i32 = arith.constant 0 : i32
    %c0_i32_0 = arith.constant 0 : i32
    %c0_i32_1 = arith.constant 0 : i32
    return %c0_i32, %c0_i32_0 : i32, i32
  }
  func.func @transform_4(%arg0: i32, %arg1: memref<1xi32, #tpu.memory_space<smem>>) -> (i32, i32) {
    %c0_i32 = arith.constant 0 : i32
    %c0_i32_0 = arith.constant 0 : i32
    %c0_i32_1 = arith.constant 0 : i32
    return %c0_i32, %c0_i32_0 : i32, i32
  }
  func.func @transform_5(%arg0: i32, %arg1: memref<1xi32, #tpu.memory_space<smem>>) -> (i32, i32) {
    %c0_i32 = arith.constant 0 : i32
    %c0_i32_0 = arith.constant 0 : i32
    return %arg0, %c0_i32 : i32, i32
  }
}

</mosaic_0001>

<bundles_post_ra>
// kernel: tpu_custom_call.1
= control target key start
LH: loop header
LB: loop body
LE: loop exit
PB: predicated region body
PF: predicated region fallthrough
CT: control target
= control target key end

     0   :  { %s4224_s0 = inlined_call_operand.<no memory space> [shape: s32[1], index: 0, kind: input, shape index: {}]   ;;  %s4225_s1 = inlined_call_operand.hbm [shape: f32[512,128], index: 1, kind: input, shape index: {}]   ;;  %s4226_s2 = inlined_call_operand.hbm [shape: bf16[128,512], index: 2, kind: input, shape index: {}]   ;;  %s4227_s3 = inlined_call_operand.vmem [shape: f32[1,512], index: 3, kind: input, shape index: {}]   ;;  %s4228_s4 = inlined_call_operand.hbm [shape: bf16[512,128], index: 4, kind: input, shape index: {}]   ;;  %s4229_s5 = inlined_call_operand.vmem [shape: f32[1,128], index: 5, kind: input, shape index: {}]   ;;  %s4230_s6 = inlined_call_operand.hbm [shape: f32[512,128], index: 6, kind: output, shape index: {}]  }
   0x1   :  { %11 = sst [smem:[#allocation4]] %s4224_s0 }
   0x2   :  { %12 = vsyncpa [#allocation6], 0 }
   0x3   :  { %14 = vsyncpa [#allocation6 + $0x1], 0 }
   0x4   :  { %15 = vsyncpa [#allocation9], 0 }
   0x5   :  { %16 = vsyncpa [#allocation7], 0 }
   0x6   :  { %18 = vsyncpa [#allocation7 + $0x1], 0  ;;  %s3292_s23 = smov 0   ;;  %s3294_s24 = smov 0  }
   0x7   :  { %s3296_s25 = smov 0   ;;  %s3298_s26 = smov 0  }
   0x8 LB: > { %s3313_s0 = sadd.s32 4294967295, %s3239_s26   ;;  %s2616_s27 = sadd.s32 4294967294, %s3239_s26   ;;  %s3239_s26 = sphi %s3298_s26, %s4250_s26   ;;  %s3235_s25 = sphi %s3296_s25, %s4249_s25   ;;  %s3231_s24 = sphi %s3294_s24, %s4248_s24   ;;  %s3227_s23 = sphi %s3292_s23, %s4247_s23  }
   0x9   : > { %p44_p0 = scmp.ne.s32.totalorder %s3231_s24, %s3227_s23  ;;  %p4231_p1 = scmp.eq.s32.totalorder %s3313_s0, 0 }
   0xa   : > { %p158_p3 = scmp.eq.s32.totalorder %s2616_s27, 1  ;;  %p2617_p5 = scmp.ge.s32.totalorder %s3239_s26, 1 }
   0xb   : > { %p3322_p4 = por %p4231_p1, %p44_p0  ;;  %p165_p7 = scmp.lt.s32.totalorder %s3239_s26, 3 }
   0xc   : > { %p3327_p6 = por %p158_p3, %p44_p0  ;;  %s3241_s7 = smov [#allocation8]  }
   0xd   : > { %s4234_s28 = scalar_select %p3322_p4, 1, 0 }
   0xe   : > { %s4235_s29 = scalar_select %p3327_p6, 1, 0 }
   0xf   : > { %p3332_p8 = pnand %p2617_p5, %p165_p7  ;;  %s177_s8 = sshll.u32 %s3241_s7, 4  ;;  %s3336_s8 = int_to_ptr.vmem [resolvable:$true] %s177_s8 }
  0x10   : > { %s3242_s10 = smov [#allocation10]   ;;  %s3083_s14 = scalar_lea.hbm %s4226_s2, 4096 }
  0x11   : > { %p2938_p9 = pneg %p3332_p8  ;;  %s193_s11 = sshll.u32 %s3242_s10, 4  ;;  %s3347_s11 = int_to_ptr.vmem [resolvable:$true] %s193_s11 }
  0x12   : > { %p3084_p12 = scmp.ne.s32.totalorder %s4226_s2, %s3083_s14  ;;  %p3090_p5 = scmp.lt.u32.totalorder %s3083_s14, %s4226_s2 }
  0x13   : > { %p3343_p11 = pnand %p2938_p9, %p4231_p1 }
  0x15   : > { %p3085_p13 = pneg %p3343_p11 }
  0x17   : > { %p3086_p0 = pnand %p3085_p13, %p3084_p12 }
  0x19   : > { %p3087_p3 = pneg %p3086_p0 }
  0x1b   : > { %p3092_p7 = pnand %p3090_p5, %p3087_p3 }
  0x1d   : > { %3095 = shalt.err (!%p3092_p7)
}
  0x1e   : > { %s3096_s19 = scalar_lea.vmem %s3336_s8, 4096  ;;  %p3104_p2 = scmp.lt.s32.totalorder %s3336_s8, %s3336_s8 }
  0x1f   : > { %p3097_p9 = scmp.ne.s32.totalorder %s3336_s8, %s3096_s19  ;;  %p3105_p12 = scmp.lt.s32.totalorder %s3096_s19, %s3096_s19 }
  0x21   : > { %p3099_p10 = pnand %p3097_p9, %p3085_p13  ;;  %p3106_p0 = por %p3105_p12, %p3104_p2 }
  0x23   : > { %p3100_p1 = pneg %p3099_p10 }
  0x25   : > { %p3107_p6 = pnand %p3106_p0, %p3100_p1 }
  0x27   : > { %3110 = shalt.err (!%p3107_p6)
}
  0x28   : > { %s3243_s20 = smov 256   ;;  %s3244_s21 = smov 16  }
  0x29   : > { %2941 = dma.hbm_to_vmem [thread:$0]  (!%p3343_p11), %s4226_s2, 4096, %s3336_s8, [#allocation9], %s3243_s20, %s3243_s20, %s3244_s21  }
  0x2a   : > { %s3111_s12 = scalar_lea.hbm %s4228_s4, 4096 }
  0x2b   : > { %p3112_p2 = scmp.ne.s32.totalorder %s4228_s4, %s3111_s12  ;;  %p3118_p10 = scmp.lt.u32.totalorder %s3111_s12, %s4228_s4 }
  0x2d   : > { %p3114_p1 = pnand %p3112_p2, %p3085_p13 }
  0x2f   : > { %p3115_p6 = pneg %p3114_p1 }
  0x31   : > { %p3120_p3 = pnand %p3118_p10, %p3115_p6 }
  0x33   : > { %3123 = shalt.err (!%p3120_p3)
}
  0x34   : > { %s3124_s8 = scalar_lea.vmem %s3347_s11, 4096  ;;  %p3132_p12 = scmp.lt.s32.totalorder %s3347_s11, %s3347_s11 }
  0x35   : > { %p3125_p5 = scmp.ne.s32.totalorder %s3347_s11, %s3124_s8  ;;  %p3133_p0 = scmp.lt.s32.totalorder %s3124_s8, %s3124_s8 }
  0x37   : > { %p3127_p7 = pnand %p3125_p5, %p3085_p13  ;;  %p3134_p2 = por %p3133_p0, %p3132_p12 }
  0x39   : > { %p3128_p9 = pneg %p3127_p7 }
  0x3b   : > { %p3135_p1 = pnand %p3134_p2, %p3128_p9 }
  0x3d   : > { %3138 = shalt.err (!%p3135_p1)
}
  0x3e   : > { %s3245_s17 = smov 64   ;;  %s3246_s18 = smov 4  }
  0x3f   : > { %2944 = dma.hbm_to_vmem [thread:$0]  (!%p3343_p11), %s4228_s4, 4096, %s3347_s11, [#allocation9], %s3245_s17, %s3245_s17, %s3246_s18  }
  0x40   : > { %s3402_s21 = sadd.s32 1, %s3239_s26   ;;  %s31_s27 = sadd.s32 1, %s3235_s25 }
  0x41   : > { %s28_s22 = ssub.s32 %s3239_s26, %s3402_s21  ;;  %p38_p6 = scmp.ne.s32.totalorder %s3235_s25, %s3231_s24 }
  0x42   : > { %p29_p13 = scmp.eq.s32.totalorder %s28_s22, 0  ;;  %p39_p10 = scmp.eq.s32.totalorder %s3239_s26, 0 }
  0x43   : > { %p4238_p5 = scmp.eq.s32.totalorder %s3313_s0, 1  ;;  %p2955_p9 = scmp.lt.s32.totalorder %s3239_s26, 2 }
  0x44   : > { %s3411_s7 = scalar_select %p29_p13, %s3235_s25, %s31_s27  }
  0x45   : > { %p40_p3 = por %p39_p10, %p38_p6  ;;  %p3415_p7 = por %p4238_p5, %p38_p6 }
  0x46   : > { %s210_s9 = sand.u32 1, %s3235_s25   ;;  %s2700_s11 = sshll.u32 %s3239_s26, 12 }
  0x47   : > { %s4239_s10 = scalar_select %p3415_p7, 1, 0 }
  0x48   : > { %s2621_s12 = sshll.u32 %s210_s9, 8  ;;  %s3425_s15 = scalar_lea.hbm %s4225_s1, %s2700_s11 }
  0x49   : > { %s214_s16 = scalar_lea.vmem [#allocation5], %s2621_s12  ;;  %p3429_p11 = pnand %p2955_p9, %p40_p3 }
  0x4a   : > { %s221_s8 = sshll.u32 %s214_s16, 4  ;;  %s3433_s18 = scalar_lea.sflag [#allocation6], %s210_s9  ;;  %s3427_s8 = int_to_ptr.vmem [resolvable:$true] %s221_s8 }
  0x4b   : > { %s3139_s19 = scalar_lea.hbm %s3425_s15, 4096  ;;  %p3141_p0 = pneg %p3429_p11 }
  0x4c   : > { %p3140_p12 = scmp.ne.s32.totalorder %s3425_s15, %s3139_s19  ;;  %s3144_s27 = scalar_lea.hbm %s4225_s1, 8192 }
  0x4d   : > { %p3145_p13 = scmp.lt.u32.totalorder %s3425_s15, %s4225_s1  ;;  %p3146_p6 = scmp.lt.u32.totalorder %s3144_s27, %s3139_s19 }
  0x4e   : > { %p3142_p2 = pnand %p3141_p0, %p3140_p12  ;;  %p3148_p3 = scmp.lt.u32.totalorder %s3139_s19, %s3425_s15 }
  0x4f   : > { %p3147_p10 = por %p3146_p6, %p3145_p13 }
  0x50   : > { %p3143_p1 = pneg %p3142_p2 }
  0x51   : > { %p3149_p5 = por %p3148_p3, %p3147_p10 }
  0x53   : > { %p3150_p9 = pnand %p3149_p5, %p3143_p1 }
  0x55   : > { %3153 = shalt.err (!%p3150_p9)
}
  0x56   : > { %s3154_s9 = scalar_lea.vmem %s3427_s8, 4096  ;;  %s3247_s13 = smov [#allocation5]  }
  0x57   : > { %p3155_p12 = scmp.ne.s32.totalorder %s3427_s8, %s3154_s9  ;;  %s3159_s14 = sshll.u32 %s3247_s13, 4  ;;  %s3160_s14 = int_to_ptr.vmem [resolvable:$false] %s3159_s14 }
  0x58   : > { %s3161_s16 = scalar_lea.vmem %s3160_s14, 8192  ;;  %p3162_p4 = scmp.lt.s32.totalorder %s3427_s8, %s3160_s14 }
  0x59   : > { %p3157_p2 = pnand %p3155_p12, %p3141_p0  ;;  %p3163_p13 = scmp.lt.s32.totalorder %s3161_s16, %s3154_s9 }
  0x5b   : > { %p3158_p7 = pneg %p3157_p2  ;;  %p3164_p6 = por %p3163_p13, %p3162_p4 }
  0x5d   : > { %p3165_p10 = pnand %p3164_p6, %p3158_p7 }
  0x5f   : > { %3168 = shalt.err (!%p3165_p10)
}
  0x60   : > { %s3248_s19 = smov 128   ;;  %s3249_s20 = smov 8  }
  0x61   : > { %2948 = dma.hbm_to_vmem [thread:$0]  (!%p3429_p11), %s3425_s15, 4096, %s3427_s8, %s3433_s18, %s3248_s19, %s3248_s19, %s3249_s20  }
  0x62   : > { %233 = sbr.rel (%p3332_p8) target bundleno = 724 (0x2d4), region = 40  ;;  %s3464_s22 = sand.u32 (!%p3332_p8), 1, %s3231_s24  }
  0x63   : > { %s2625_s27 = sshll.u32 (!%p3332_p8), %s3464_s22, 8  ;;  %s236_s12 = scalar_lea.sflag (!%p3332_p8), [#allocation6], %s3464_s22 }
  0x64   : > { %s3470_s11 = scalar_lea.vmem (!%p3332_p8), [#allocation5], %s2625_s27  ;;  %p4241_p4 = scmp.ne.s32.totalorder (!%p3332_p8), %s4234_s28, 0 }
  0x69   : > { %3214 = dma.done.wait (%p4241_p4), %s236_s12, 4096  }
  0x6a   : > { %3216 = vsyncadd (%p4241_p4), %s236_s12, 4294963200  ;;  %p4242_p7 = scmp.eq.s32.totalorder %s3313_s0, 0 }
  0x6c   : > { %3218 = dma.done.wait (%p4242_p7), [#allocation9], 8192   ;;  %p4243_p8 = pmov %p4242_p7 }
  0x6d   : > { %v3250_v0 = vmov 0   ;;  %v3002_v1 = vld [vmem:[#allocation8 + $0x4] ss:$16 sps:$4 sm:$0xff]   ;;  %v3004_v2 = vld [vmem:[#allocation8 + $0xc] ss:$16 sps:$4 sm:$0xff]   ;;  %s2694_s15 = sshll.u32 %s3313_s0, 8 }
  0x6e   : > { %3220 = vsyncadd (%p4243_p8), [#allocation9], 4294959104  ;;  %571 = vmatprep.mubr.bf16.mxu0 %v3250_v0  ;;  %764 = vmatprep.mubr.bf16.mxu1 %v3250_v0  ;;  %v3006_v3 = vld [vmem:[#allocation8] ss:$16 sps:$4 sm:$0xff]   ;;  %v3007_v4 = vld [vmem:[#allocation8 + $0x8] ss:$16 sps:$4 sm:$0xff]  }
  0x6f   : > { %539 = vmatprep.subr.bf16.mxu0 %v3002_v1  ;;  %732 = vmatprep.subr.bf16.mxu1 %v3004_v2  ;;  %v3008_v5 = vld [vmem:[#allocation8 + $0x24] ss:$16 sps:$4 sm:$0xff]   ;;  %v3010_v6 = vld [vmem:[#allocation8 + $0x2c] ss:$16 sps:$4 sm:$0xff]   ;;  %v3012_v7 = vld [vmem:[#allocation8 + $0x20] ss:$16 sps:$4 sm:$0xff]  }
  0x70   : > { %540 = vmatpush1.bf16.msra.mxu0 %v3006_v3  ;;  %733 = vmatpush1.bf16.msra.mxu1 %v3007_v4  ;;  %v3013_v8 = vld [vmem:[#allocation8 + $0x28] ss:$16 sps:$4 sm:$0xff]   ;;  %v3014_v9 = vld [vmem:[#allocation8 + $0x44] ss:$16 sps:$4 sm:$0xff]   ;;  %v3016_v10 = vld [vmem:[#allocation8 + $0x4c] ss:$16 sps:$4 sm:$0xff]  }
  0x71   : > { %541 = vmatprep.subr.bf16.mxu0 %v3008_v5  ;;  %734 = vmatprep.subr.bf16.mxu1 %v3010_v6  ;;  %v3018_v11 = vld [vmem:[#allocation8 + $0x40] ss:$16 sps:$4 sm:$0xff]   ;;  %v3019_v12 = vld [vmem:[#allocation8 + $0x48] ss:$16 sps:$4 sm:$0xff]   ;;  %v3020_v13 = vld [vmem:[#allocation8 + $0x64] ss:$16 sps:$4 sm:$0xff]  }
  0x72   : > { %v3022_v14 = vld [vmem:[#allocation8 + $0x6c] ss:$16 sps:$4 sm:$0xff]   ;;  %v3024_v15 = vld [vmem:[#allocation8 + $0x60] ss:$16 sps:$4 sm:$0xff]   ;;  %v3025_v16 = vld [vmem:[#allocation8 + $0x68] ss:$16 sps:$4 sm:$0xff]  }
  0x73   : > { %v3026_v17 = vld [vmem:[#allocation8 + $0x84] ss:$16 sps:$4 sm:$0xff]   ;;  %v3028_v18 = vld [vmem:[#allocation8 + $0x8c] ss:$16 sps:$4 sm:$0xff]   ;;  %v3030_v19 = vld [vmem:[#allocation8 + $0x80] ss:$16 sps:$4 sm:$0xff]  }
  0x74   : > { %542 = vmatpush1.bf16.msra.mxu0 %v3012_v7  ;;  %735 = vmatpush1.bf16.msra.mxu1 %v3013_v8  ;;  %v3031_v20 = vld [vmem:[#allocation8 + $0x88] ss:$16 sps:$4 sm:$0xff]   ;;  %v3032_v21 = vld [vmem:[#allocation8 + $0xa4] ss:$16 sps:$4 sm:$0xff]   ;;  %v3034_v22 = vld [vmem:[#allocation8 + $0xac] ss:$16 sps:$4 sm:$0xff]  }
  0x75   : > { %543 = vmatprep.subr.bf16.mxu0 %v3014_v9  ;;  %736 = vmatprep.subr.bf16.mxu1 %v3016_v10  ;;  %v3036_v23 = vld [vmem:[#allocation8 + $0xa0] ss:$16 sps:$4 sm:$0xff]   ;;  %v3037_v24 = vld [vmem:[#allocation8 + $0xa8] ss:$16 sps:$4 sm:$0xff]   ;;  %v3038_v25 = vld [vmem:[#allocation8 + $0xc4] ss:$16 sps:$4 sm:$0xff]  }
  0x76   : > { %v3040_v26 = vld [vmem:[#allocation8 + $0xcc] ss:$16 sps:$4 sm:$0xff]   ;;  %v3042_v27 = vld [vmem:[#allocation8 + $0xc0] ss:$16 sps:$4 sm:$0xff]   ;;  %v3043_v28 = vld [vmem:[#allocation8 + $0xc8] ss:$16 sps:$4 sm:$0xff]  }
  0x77   : > { %v3044_v29 = vld [vmem:[#allocation8 + $0xe4] ss:$16 sps:$4 sm:$0xff]   ;;  %v3046_v30 = vld [vmem:[#allocation8 + $0xec] ss:$16 sps:$4 sm:$0xff]   ;;  %v3048_v31 = vld [vmem:[#allocation8 + $0xe0] ss:$16 sps:$4 sm:$0xff]  }
  0x78   : > { %544 = vmatpush1.bf16.msra.mxu0 %v3018_v11  ;;  %737 = vmatpush1.bf16.msra.mxu1 %v3019_v12  ;;  %v3049_v32 = vld [vmem:[#allocation8 + $0xe8] ss:$16 sps:$4 sm:$0xff]   ;;  %v277_v33 = vld [vmem:[%s3470_s11] sm:$0xff]  ;;  %v279_v40 = vld [vmem:[%s3470_s11 + $0x10] sm:$0xff]  ;;  %s2091_s8 = sld [smem:[#allocation4]]  ;;  %s3814_s13 = scalar_lea.vmem [#allocation11], %s2625_s27 }
  0x79   : > { %545 = vmatprep.subr.bf16.mxu0 %v3020_v13  ;;  %738 = vmatprep.subr.bf16.mxu1 %v3022_v14  ;;  %v278_v34 = vld [vmem:[%s3470_s11 + $0x8] sm:$0xff]  ;;  %v3050_v35 = vld [vmem:[#allocation10 + $0x40] sm:$0xff]   ;;  %v280_v42 = vld [vmem:[%s3470_s11 + $0x18] sm:$0xff]  ;;  %s2701_s19 = sshll.u32 %s3313_s0, 12  ;;  %s2524_s20 = sshll.u32 %s3814_s13, 4  ;;  %s4178_s20 = int_to_ptr.vmem [resolvable:$true] %s2524_s20 }
  0x7a   : > { %v309_v36 = vpack.c.bf16 %v278_v34, %v277_v33  ;;  %v3051_v37 = vld [vmem:[#allocation10] sm:$0xff]   ;;  %v3054_v41 = vld [vmem:[#allocation10 + $0x48] sm:$0xff]   ;;  %v310_v45 = vpack.c.bf16 %v280_v42, %v279_v40  ;;  %v3058_v47 = vld [vmem:[#allocation10 + $0x50] sm:$0xff]   ;;  %s2511_s0 = scalar_lea.sflag [#allocation7], %s3464_s22  ;;  %s3169_s28 = scalar_lea.vmem %s4178_s20, 4096 }
  0x7b   : > { %v3052_v38 = vld [vmem:[#allocation10 + $0xc0] sm:$0xff]   ;;  %v3055_v43 = vld [vmem:[#allocation10 + $0x8] sm:$0xff]   ;;  %v3059_v48 = vld [vmem:[#allocation10 + $0x10] sm:$0xff]   ;;  %p3170_p11 = scmp.ne.s32.totalorder %s4178_s20, %s3169_s28  ;;  %p4244_p0 = scmp.ne.s32.totalorder %s4239_s10, 0 }
  0x7c   : > { %546 = vmatpush1.bf16.msra.mxu0 %v3024_v15  ;;  %739 = vmatpush1.bf16.msra.mxu1 %v3025_v16  ;;  %v3053_v39 = vld [vmem:[#allocation10 + $0x80] sm:$0xff]   ;;  %v3056_v44 = vld [vmem:[#allocation10 + $0xc8] sm:$0xff]   ;;  %v3060_v51 = vld [vmem:[#allocation10 + $0xd0] sm:$0xff]   ;;  %s3251_s30 = smov [#allocation11]  }
  0x7d   : > { %547 = vmatprep.subr.bf16.mxu0 %v3026_v17  ;;  %740 = vmatprep.subr.bf16.mxu1 %v3028_v18  ;;  %v3057_v46 = vld [vmem:[#allocation10 + $0x88] sm:$0xff]   ;;  %v281_v49 = vld [vmem:[%s3470_s11 + $0x20] sm:$0xff]  ;;  %v3061_v52 = vld [vmem:[#allocation10 + $0x90] sm:$0xff]   ;;  %p3171_p1 = pnand %p3170_p11, %p4244_p0 }
  0x7e   : > { %v282_v50 = vld [vmem:[%s3470_s11 + $0x28] sm:$0xff]  ;;  %v3062_v53 = vld [vmem:[#allocation10 + $0x58] sm:$0xff]   ;;  %v3066_v58 = vld [vmem:[#allocation10 + $0x60] sm:$0xff]   ;;  %s2092_s17 = smul.u32 2654435761, %s2091_s8 }
  0x7f   : > { %v3063_v54 = vld [vmem:[#allocation10 + $0x18] sm:$0xff]   ;;  %v311_v56 = vpack.c.bf16 %v282_v50, %v281_v49  ;;  %v3067_v59 = vld [vmem:[#allocation10 + $0x20] sm:$0xff]   ;;  %v283_v60 = vld [vmem:[%s3470_s11 + $0x30] sm:$0xff]  ;;  %v359_v50 = vlaneseq  ;;  %p3172_p3 = pneg %p3171_p1 }
  0x80   : > { %548 = vmatpush1.bf16.msra.mxu0 %v3030_v19  ;;  %741 = vmatpush1.bf16.msra.mxu1 %v3031_v20  ;;  %v3064_v55 = vld [vmem:[#allocation10 + $0xd8] sm:$0xff]   ;;  %v3068_v62 = vld [vmem:[#allocation10 + $0xe0] sm:$0xff]   ;;  %v3070_v1 = vld [vmem:[#allocation10 + $0x68] sm:$0xff]  }
  0x81   : > { %549 = vmatprep.subr.bf16.mxu0 %v3032_v21  ;;  %742 = vmatprep.subr.bf16.mxu1 %v3034_v22  ;;  %v3065_v57 = vld [vmem:[#allocation10 + $0x98] sm:$0xff]   ;;  %v3069_v63 = vld [vmem:[#allocation10 + $0xa0] sm:$0xff]   ;;  %v3071_v2 = vld [vmem:[#allocation10 + $0x28] sm:$0xff]  }
  0x82   : > { %v284_v61 = vld [vmem:[%s3470_s11 + $0x38] sm:$0xff]  ;;  %v3072_v3 = vld [vmem:[#allocation10 + $0xe8] sm:$0xff]   ;;  %v3074_v6 = vld [vmem:[#allocation10 + $0x70] sm:$0xff]  }
  0x83   : > { %v312_v4 = vpack.c.bf16 %v284_v61, %v283_v60  ;;  %v3073_v5 = vld [vmem:[#allocation10 + $0xa8] sm:$0xff]   ;;  %v3075_v7 = vld [vmem:[#allocation10 + $0x30] sm:$0xff]   ;;  %v285_v8 = vld [vmem:[%s3470_s11 + $0x40] sm:$0xff] }
  0x84   : > { %550 = vmatpush1.bf16.msra.mxu0 %v3036_v23  ;;  %743 = vmatpush1.bf16.msra.mxu1 %v3037_v24  ;;  %v286_v9 = vld [vmem:[%s3470_s11 + $0x48] sm:$0xff]  ;;  %v3076_v10 = vld [vmem:[#allocation10 + $0xf0] sm:$0xff]   ;;  %v3078_v12 = vld [vmem:[#allocation10 + $0x78] sm:$0xff]  }
  0x85   : > { %551 = vmatprep.subr.bf16.mxu0 %v3038_v25  ;;  %744 = vmatprep.subr.bf16.mxu1 %v3040_v26  ;;  %v3077_v11 = vld [vmem:[#allocation10 + $0xb0] sm:$0xff]   ;;  %v3079_v13 = vld [vmem:[#allocation10 + $0x38] sm:$0xff]   ;;  %v313_v15 = vpack.c.bf16 %v286_v9, %v285_v8  ;;  %v289_v20 = vld [vmem:[%s3470_s11 + $0x60] sm:$0xff] }
  0x86   : > { %v3080_v14 = vld [vmem:[#allocation10 + $0xf8] sm:$0xff]   ;;  %v287_v17 = vld [vmem:[%s3470_s11 + $0x50] sm:$0xff]  ;;  %v290_v21 = vld [vmem:[%s3470_s11 + $0x68] sm:$0xff] }
  0x87   : > { %v3081_v16 = vld [vmem:[#allocation10 + $0xb8] sm:$0xff]   ;;  %v315_v22 = vpack.c.bf16 %v290_v21, %v289_v20  ;;  %v291_v23 = vld [vmem:[%s3470_s11 + $0x70] sm:$0xff]  ;;  %v293_v26 = vld [vmem:[%s3470_s11 + $0x80] sm:$0xff] }
  0x88   : > { %552 = vmatpush1.bf16.msra.mxu0 %v3042_v27  ;;  %745 = vmatpush1.bf16.msra.mxu1 %v3043_v28  ;;  %v288_v18 = vld [vmem:[%s3470_s11 + $0x58] sm:$0xff]  ;;  %v294_v27 = vld [vmem:[%s3470_s11 + $0x88] sm:$0xff] }
  0x89   : > { %553 = vmatprep.subr.bf16.mxu0 %v3044_v29  ;;  %746 = vmatprep.subr.bf16.mxu1 %v3046_v30  ;;  %v314_v19 = vpack.c.bf16 %v288_v18, %v287_v17  ;;  %v292_v24 = vld [vmem:[%s3470_s11 + $0x78] sm:$0xff]  ;;  %v317_v28 = vpack.c.bf16 %v294_v27, %v293_v26  ;;  %v295_v29 = vld [vmem:[%s3470_s11 + $0x90] sm:$0xff]  ;;  %v298_v33 = vld [vmem:[%s3470_s11 + $0xa8] sm:$0xff] }
  0x8a   : > { %v316_v25 = vpack.c.bf16 %v292_v24, %v291_v23  ;;  %v296_v30 = vld [vmem:[%s3470_s11 + $0x98] sm:$0xff] }
  0x8b   : > { %v304_v42 = vld [vmem:[%s3470_s11 + $0xd8] sm:$0xff] }
  0x8c   : > { %554 = vmatpush1.bf16.msra.mxu0 %v3048_v31  ;;  %747 = vmatpush1.bf16.msra.mxu1 %v3049_v32  ;;  %v318_v31 = vpack.c.bf16 %v296_v30, %v295_v29  ;;  %v297_v32 = vld [vmem:[%s3470_s11 + $0xa0] sm:$0xff] }
  0x8d   : > { %2702 = vmatprep.subr.bf16.mxu0 %v3050_v35  ;;  %2814 = vmatprep.subr.bf16.mxu1 %v3052_v38  ;;  %v319_v34 = vpack.c.bf16 %v298_v33, %v297_v32  ;;  %v299_v35 = vld [vmem:[%s3470_s11 + $0xb0] sm:$0xff]  ;;  %v301_v38 = vld [vmem:[%s3470_s11 + $0xc0] sm:$0xff] }
  0x8f   : > { %572 = vmatmul.mubr.bf16.vlgmr.msra.gmra.mrb[0].mxu0 %v309_v36  ;;  %765 = vmatmul.mubr.bf16.vlgmr.msra.gmra.mrb[0].mxu1 %v309_v36  ;;  %v300_v36 = vld [vmem:[%s3470_s11 + $0xb8] sm:$0xff] }
  0x90   : > { %581 = vmatprep.mubr.bf16.mxu0 %v3250_v0  ;;  %774 = vmatprep.mubr.bf16.mxu1 %v3250_v0 }
  0x91   : > { %2703 = vmatpush3.bf16.msra.mxu0 %v3051_v37  ;;  %2815 = vmatpush3.bf16.msra.mxu1 %v3053_v39  ;;  %v320_v37 = vpack.c.bf16 %v300_v36, %v299_v35  ;;  %v302_v39 = vld [vmem:[%s3470_s11 + $0xc8] sm:$0xff] }
  0x92   : > { %2704 = vmatprep.subr.bf16.mxu0 %v3054_v41  ;;  %2816 = vmatprep.subr.bf16.mxu1 %v3056_v44  ;;  %v321_v40 = vpack.c.bf16 %v302_v39, %v301_v38  ;;  %v303_v41 = vld [vmem:[%s3470_s11 + $0xd0] sm:$0xff]  ;;  %v305_v44 = vld [vmem:[%s3470_s11 + $0xe0] sm:$0xff] }
  0x95   : > { %2705 = vmatpush3.bf16.msra.mxu0 %v3055_v43  ;;  %2817 = vmatpush3.bf16.msra.mxu1 %v3057_v46  ;;  %v322_v43 = vpack.c.bf16 %v304_v42, %v303_v41 }
  0x96   : > { %2706 = vmatprep.subr.bf16.mxu0 %v3058_v47  ;;  %2818 = vmatprep.subr.bf16.mxu1 %v3060_v51  ;;  %v307_v47 = vld [vmem:[%s3470_s11 + $0xf0] sm:$0xff]  ;;  %v3545_v51 = vshrl.u32 %v359_v50, 7 }
  0x97   : > { %582 = vmatmul.mubr.bf16.gmra.mrb[4].mxu0 %v310_v45  ;;  %775 = vmatmul.mubr.bf16.gmra.mrb[4].mxu1 %v310_v45  ;;  %v306_v45 = vld [vmem:[%s3470_s11 + $0xe8] sm:$0xff] }
  0x98   : > { %591 = vmatprep.mubr.bf16.mxu0 %v3250_v0  ;;  %784 = vmatprep.mubr.bf16.mxu1 %v3250_v0  ;;  %v323_v46 = vpack.c.bf16 %v306_v45, %v305_v44 }
  0x99   : > { %2707 = vmatpush3.bf16.msra.mxu0 %v3059_v48  ;;  %2819 = vmatpush3.bf16.msra.mxu1 %v3061_v52  ;;  %v308_v48 = vld [vmem:[%s3470_s11 + $0xf8] sm:$0xff]  ;;  %v361_v52 = vsub.s32 0, %v3545_v51  ;;  %s4176_s11 = scalar_lea.hbm %s4230_s6, %s2701_s19 }
  0x9a   : > { %2708 = vmatprep.subr.bf16.mxu0 %v3062_v53  ;;  %2820 = vmatprep.subr.bf16.mxu1 %v3064_v55  ;;  %v324_v49 = vpack.c.bf16 %v308_v48, %v307_v47  ;;  %v369_v53 = vsub.s32 2, %v3545_v51  ;;  %v365_v55 = vsub.s32 1, %v3545_v51 }
  0x9d   : > { %2709 = vmatpush3.bf16.msra.mxu0 %v3063_v54  ;;  %2821 = vmatpush3.bf16.msra.mxu1 %v3065_v57  ;;  %v357_v54 = vld [vmem:[%s4227_s3] sm:$0xf] }
  0x9e   : > { %2710 = vmatprep.subr.bf16.mxu0 %v3066_v58  ;;  %2822 = vmatprep.subr.bf16.mxu1 %v3068_v62  ;;  %v3556_v57 = vrot.slane %v357_v54, %v369_v53  ;;  %v3558_v58 = vrot.slane %v357_v54, %v365_v55 }
  0x9f   : > { %592 = vmatmul.mubr.bf16.gmra.mrb[8].mxu0 %v311_v56  ;;  %785 = vmatmul.mubr.bf16.gmra.mrb[8].mxu1 %v311_v56  ;;  %v3554_v56 = vrot.slane %v357_v54, %v361_v52 }
  0xa0   : > { %601 = vmatprep.mubr.bf16.mxu0 %v3250_v0  ;;  %794 = vmatprep.mubr.bf16.mxu1 %v3250_v0 }
  0xa1   : > { %2711 = vmatpush3.bf16.msra.mxu0 %v3067_v59  ;;  %2823 = vmatpush3.bf16.msra.mxu1 %v3069_v63 }
  0xa2   : > { %2712 = vmatprep.subr.bf16.mxu0 %v3070_v1  ;;  %2824 = vmatprep.subr.bf16.mxu1 %v3072_v3 }
  0xa5   : > { %2713 = vmatpush3.bf16.msra.mxu0 %v3071_v2  ;;  %2825 = vmatpush3.bf16.msra.mxu1 %v3073_v5 }
  0xa6   : > { %2714 = vmatprep.subr.bf16.mxu0 %v3074_v6  ;;  %2826 = vmatprep.subr.bf16.mxu1 %v3076_v10 }
  0xa7   : > { %602 = vmatmul.mubr.bf16.gmra.mrb[12].mxu0 %v312_v4  ;;  %795 = vmatmul.mubr.bf16.gmra.mrb[12].mxu1 %v312_v4 }
  0xa8   : > { %611 = vmatprep.mubr.bf16.mxu0 %v3250_v0  ;;  %804 = vmatprep.mubr.bf16.mxu1 %v3250_v0 }
  0xa9   : > { %2715 = vmatpush3.bf16.msra.mxu0 %v3075_v7  ;;  %2827 = vmatpush3.bf16.msra.mxu1 %v3077_v11 }
  0xaa   : > { %2716 = vmatprep.subr.bf16.mxu0 %v3078_v12  ;;  %2828 = vmatprep.subr.bf16.mxu1 %v3080_v14 }
  0xad   : > { %2717 = vmatpush3.bf16.msra.mxu0 %v3079_v13  ;;  %2829 = vmatpush3.bf16.msra.mxu1 %v3081_v16 }
  0xaf   : > { %612 = vmatmul.mubr.bf16.gmra.mrb[16].mxu0 %v313_v15  ;;  %805 = vmatmul.mubr.bf16.gmra.mrb[16].mxu1 %v313_v15 }
  0xb0   : > { %621 = vmatprep.mubr.bf16.mxu0 %v3250_v0  ;;  %814 = vmatprep.mubr.bf16.mxu1 %v3250_v0 }
  0xb7   : > { %622 = vmatmul.mubr.bf16.gmra.mrb[20].mxu0 %v314_v19  ;;  %815 = vmatmul.mubr.bf16.gmra.mrb[20].mxu1 %v314_v19 }
  0xb8   : > { %631 = vmatprep.mubr.bf16.mxu0 %v3250_v0  ;;  %824 = vmatprep.mubr.bf16.mxu1 %v3250_v0 }
  0xbf   : > { %632 = vmatmul.mubr.bf16.gmra.mrb[24].mxu0 %v315_v22  ;;  %825 = vmatmul.mubr.bf16.gmra.mrb[24].mxu1 %v315_v22 }
  0xc0   : > { %641 = vmatprep.mubr.bf16.mxu0 %v3250_v0  ;;  %834 = vmatprep.mubr.bf16.mxu1 %v3250_v0 }
  0xc7   : > { %642 = vmatmul.mubr.bf16.gmra.mrb[28].mxu0 %v316_v25  ;;  %835 = vmatmul.mubr.bf16.gmra.mrb[28].mxu1 %v316_v25 }
  0xc8   : > { %651 = vmatprep.mubr.bf16.mxu0 %v3250_v0  ;;  %844 = vmatprep.mubr.bf16.mxu1 %v3250_v0 }
  0xcf   : > { %652 = vmatmul.mubr.bf16.gmra.mrb[32].mxu0 %v317_v28  ;;  %845 = vmatmul.mubr.bf16.gmra.mrb[32].mxu1 %v317_v28 }
  0xd0   : > { %661 = vmatprep.mubr.bf16.mxu0 %v3250_v0  ;;  %854 = vmatprep.mubr.bf16.mxu1 %v3250_v0 }
  0xd7   : > { %662 = vmatmul.mubr.bf16.gmra.mrb[36].mxu0 %v318_v31  ;;  %855 = vmatmul.mubr.bf16.gmra.mrb[36].mxu1 %v318_v31 }
  0xd8   : > { %671 = vmatprep.mubr.bf16.mxu0 %v3250_v0  ;;  %864 = vmatprep.mubr.bf16.mxu1 %v3250_v0 }
  0xdf   : > { %672 = vmatmul.mubr.bf16.gmra.mrb[40].mxu0 %v319_v34  ;;  %865 = vmatmul.mubr.bf16.gmra.mrb[40].mxu1 %v319_v34 }
  0xe0   : > { %681 = vmatprep.mubr.bf16.mxu0 %v3250_v0  ;;  %874 = vmatprep.mubr.bf16.mxu1 %v3250_v0 }
  0xe7   : > { %682 = vmatmul.mubr.bf16.gmra.mrb[44].mxu0 %v320_v37  ;;  %875 = vmatmul.mubr.bf16.gmra.mrb[44].mxu1 %v320_v37 }
  0xe8   : > { %691 = vmatprep.mubr.bf16.mxu0 %v3250_v0  ;;  %884 = vmatprep.mubr.bf16.mxu1 %v3250_v0 }
  0xef   : > { %692 = vmatmul.mubr.bf16.gmra.mrb[48].mxu0 %v321_v40  ;;  %885 = vmatmul.mubr.bf16.gmra.mrb[48].mxu1 %v321_v40 }
  0xf0   : > { %701 = vmatprep.mubr.bf16.mxu0 %v3250_v0  ;;  %894 = vmatprep.mubr.bf16.mxu1 %v3250_v0 }
  0xf7   : > { %702 = vmatmul.mubr.bf16.gmra.mrb[52].mxu0 %v322_v43  ;;  %895 = vmatmul.mubr.bf16.gmra.mrb[52].mxu1 %v322_v43 }
  0xf8   : > { %711 = vmatprep.mubr.bf16.mxu0 %v3250_v0  ;;  %904 = vmatprep.mubr.bf16.mxu1 %v3250_v0 }
  0xff   : > { %712 = vmatmul.mubr.bf16.gmra.mrb[56].mxu0 %v323_v46  ;;  %905 = vmatmul.mubr.bf16.gmra.mrb[56].mxu1 %v323_v46 }
 0x100   : > { %721 = vmatprep.mubr.bf16.mxu0 %v3250_v0  ;;  %914 = vmatprep.mubr.bf16.mxu1 %v3250_v0  ;;  %v373_v0 = vsub.s32 3, %v3545_v51 }
 0x102   : > { %v3560_v59 = vrot.slane %v357_v54, %v373_v0 }
 0x107   : > { %722 = vmatmul.mubr.bf16.gmra.mrb[60].mxu0 %v324_v49  ;;  %915 = vmatmul.mubr.bf16.gmra.mrb[60].mxu1 %v324_v49 }
 0x162   : > { %v573_v60 = vpop.f32.mrb[0].mxu0  ;;  %v766_v61 = vpop.f32.mrb[0].mxu1 }
 0x163   : > { %v574_v62 = vadd.f32 %v573_v60, %v3554_v56  ;;  %v767_v63 = vadd.f32 %v766_v61, %v3556_v57  ;;  %v575_v1 = vpop.f32.mrb[1].mxu0  ;;  %v768_v2 = vpop.f32.mrb[1].mxu1 }
 0x164   : > { %v576_v3 = vadd.f32 %v575_v1, %v3558_v58  ;;  %v769_v4 = vadd.f32 %v768_v2, %v3560_v59  ;;  %v577_v5 = vpop.f32.mrb[2].mxu0  ;;  %v770_v6 = vpop.f32.mrb[2].mxu1 }
 0x165   : > { %v927_v7 = vmax.f32 %v767_v63, 0.0  ;;  %v578_v8 = vadd.f32 %v577_v5, %v3554_v56  ;;  %v771_v9 = vadd.f32 %v770_v6, %v3556_v57  ;;  %v579_v10 = vpop.f32.mrb[3].mxu0  ;;  %v772_v11 = vpop.f32.mrb[3].mxu1  ;;  %v925_v15 = vmax.f32 %v574_v62, 0.0 }
 0x166   : > { %v928_v12 = vmax.f32 %v769_v4, 0.0  ;;  %v580_v13 = vadd.f32 %v579_v10, %v3558_v58  ;;  %v773_v14 = vadd.f32 %v772_v11, %v3560_v59  ;;  %v926_v18 = vmax.f32 %v576_v3, 0.0 }
 0x167   : > { %v929_v16 = vmax.f32 %v578_v8, 0.0  ;;  %v931_v17 = vmax.f32 %v771_v9, 0.0 }
 0x168   : > { %v930_v19 = vmax.f32 %v580_v13, 0.0  ;;  %v932_v20 = vmax.f32 %v773_v14, 0.0 }
 0x169   : > { %v1309_v21 = vpack.c.bf16 %v929_v16, %v925_v15  ;;  %v1311_v22 = vpack.c.bf16 %v931_v17, %v927_v7 }
 0x16a   : > { %v1310_v23 = vpack.c.bf16 %v930_v19, %v926_v18  ;;  %v1312_v24 = vpack.c.bf16 %v932_v20, %v928_v12  ;;  %v583_v25 = vpop.f32.mrb[4].mxu0  ;;  %v776_v26 = vpop.f32.mrb[4].mxu1 }
 0x16b   : > { %v584_v27 = vadd.f32 %v583_v25, %v3554_v56  ;;  %v777_v28 = vadd.f32 %v776_v26, %v3556_v57  ;;  %v585_v29 = vpop.f32.mrb[5].mxu0  ;;  %v778_v30 = vpop.f32.mrb[5].mxu1 }
 0x16c   : > { %v586_v31 = vadd.f32 %v585_v29, %v3558_v58  ;;  %v779_v32 = vadd.f32 %v778_v30, %v3560_v59  ;;  %v587_v33 = vpop.f32.mrb[6].mxu0  ;;  %v780_v34 = vpop.f32.mrb[6].mxu1  ;;  %1668 = vmatprep.mubr.bf16.mxu0 %v1310_v23  ;;  %1829 = vmatprep.mubr.bf16.mxu1 %v1312_v24 }
 0x16d   : > { %v935_v35 = vmax.f32 %v777_v28, 0.0  ;;  %v588_v36 = vadd.f32 %v587_v33, %v3554_v56  ;;  %v781_v37 = vadd.f32 %v780_v34, %v3556_v57  ;;  %v589_v38 = vpop.f32.mrb[7].mxu0  ;;  %v782_v39 = vpop.f32.mrb[7].mxu1  ;;  %1669 = vmatmul.mubr.bf16.vlgmr.msra.gmra.mrb[64].mxu0 %v1309_v21  ;;  %1830 = vmatmul.mubr.bf16.vlgmr.msra.gmra.mrb[64].mxu1 %v1311_v22  ;;  %v933_v43 = vmax.f32 %v584_v27, 0.0 }
 0x16e   : > { %v936_v40 = vmax.f32 %v779_v32, 0.0  ;;  %v590_v41 = vadd.f32 %v589_v38, %v3558_v58  ;;  %v783_v42 = vadd.f32 %v782_v39, %v3560_v59  ;;  %v934_v46 = vmax.f32 %v586_v31, 0.0 }
 0x16f   : > { %v937_v44 = vmax.f32 %v588_v36, 0.0  ;;  %v939_v45 = vmax.f32 %v781_v37, 0.0 }
 0x170   : > { %v938_v47 = vmax.f32 %v590_v41, 0.0  ;;  %v940_v48 = vmax.f32 %v783_v42, 0.0 }
 0x171   : > { %v1313_v49 = vpack.c.bf16 %v937_v44, %v933_v43  ;;  %v1315_v52 = vpack.c.bf16 %v939_v45, %v935_v35 }
 0x172   : > { %v1314_v53 = vpack.c.bf16 %v938_v47, %v934_v46  ;;  %v1316_v54 = vpack.c.bf16 %v940_v48, %v936_v40  ;;  %v593_v55 = vpop.f32.mrb[8].mxu0  ;;  %v786_v0 = vpop.f32.mrb[8].mxu1 }
 0x173   : > { %v594_v60 = vadd.f32 %v593_v55, %v3554_v56  ;;  %v787_v61 = vadd.f32 %v786_v0, %v3556_v57  ;;  %v595_v62 = vpop.f32.mrb[9].mxu0  ;;  %v788_v63 = vpop.f32.mrb[9].mxu1 }
 0x174   : > { %v596_v1 = vadd.f32 %v595_v62, %v3558_v58  ;;  %v789_v2 = vadd.f32 %v788_v63, %v3560_v59  ;;  %v597_v3 = vpop.f32.mrb[10].mxu0  ;;  %v790_v4 = vpop.f32.mrb[10].mxu1  ;;  %1676 = vmatprep.mubr.bf16.mxu0 %v1314_v53  ;;  %1837 = vmatprep.mubr.bf16.mxu1 %v1316_v54 }
 0x175   : > { %v943_v5 = vmax.f32 %v787_v61, 0.0  ;;  %v598_v6 = vadd.f32 %v597_v3, %v3554_v56  ;;  %v791_v7 = vadd.f32 %v790_v4, %v3556_v57  ;;  %v599_v8 = vpop.f32.mrb[11].mxu0  ;;  %v792_v9 = vpop.f32.mrb[11].mxu1  ;;  %1677 = vmatmul.mubr.bf16.gmra.mrb[68].mxu0 %v1313_v49  ;;  %1838 = vmatmul.mubr.bf16.gmra.mrb[68].mxu1 %v1315_v52  ;;  %v941_v13 = vmax.f32 %v594_v60, 0.0 }
 0x176   : > { %v944_v10 = vmax.f32 %v789_v2, 0.0  ;;  %v600_v11 = vadd.f32 %v599_v8, %v3558_v58  ;;  %v793_v12 = vadd.f32 %v792_v9, %v3560_v59  ;;  %v942_v16 = vmax.f32 %v596_v1, 0.0 }
 0x177   : > { %v945_v14 = vmax.f32 %v598_v6, 0.0  ;;  %v947_v15 = vmax.f32 %v791_v7, 0.0 }
 0x178   : > { %v946_v17 = vmax.f32 %v600_v11, 0.0  ;;  %v948_v18 = vmax.f32 %v793_v12, 0.0 }
 0x179   : > { %v1317_v19 = vpack.c.bf16 %v945_v14, %v941_v13  ;;  %v1319_v20 = vpack.c.bf16 %v947_v15, %v943_v5 }
 0x17a   : > { %v1318_v21 = vpack.c.bf16 %v946_v17, %v942_v16  ;;  %v1320_v22 = vpack.c.bf16 %v948_v18, %v944_v10  ;;  %v603_v23 = vpop.f32.mrb[12].mxu0  ;;  %v796_v24 = vpop.f32.mrb[12].mxu1 }
 0x17b   : > { %v604_v25 = vadd.f32 %v603_v23, %v3554_v56  ;;  %v797_v26 = vadd.f32 %v796_v24, %v3556_v57  ;;  %v605_v27 = vpop.f32.mrb[13].mxu0  ;;  %v798_v28 = vpop.f32.mrb[13].mxu1 }
 0x17c   : > { %v606_v29 = vadd.f32 %v605_v27, %v3558_v58  ;;  %v799_v30 = vadd.f32 %v798_v28, %v3560_v59  ;;  %v607_v31 = vpop.f32.mrb[14].mxu0  ;;  %v800_v32 = vpop.f32.mrb[14].mxu1  ;;  %1684 = vmatprep.mubr.bf16.mxu0 %v1318_v21  ;;  %1845 = vmatprep.mubr.bf16.mxu1 %v1320_v22 }
 0x17d   : > { %v951_v33 = vmax.f32 %v797_v26, 0.0  ;;  %v608_v34 = vadd.f32 %v607_v31, %v3554_v56  ;;  %v801_v35 = vadd.f32 %v800_v32, %v3556_v57  ;;  %v609_v36 = vpop.f32.mrb[15].mxu0  ;;  %v802_v37 = vpop.f32.mrb[15].mxu1  ;;  %1685 = vmatmul.mubr.bf16.gmra.mrb[72].mxu0 %v1317_v19  ;;  %1846 = vmatmul.mubr.bf16.gmra.mrb[72].mxu1 %v1319_v20  ;;  %v949_v41 = vmax.f32 %v604_v25, 0.0 }
 0x17e   : > { %v952_v38 = vmax.f32 %v799_v30, 0.0  ;;  %v610_v39 = vadd.f32 %v609_v36, %v3558_v58  ;;  %v803_v40 = vadd.f32 %v802_v37, %v3560_v59  ;;  %v950_v44 = vmax.f32 %v606_v29, 0.0 }
 0x17f   : > { %v953_v42 = vmax.f32 %v608_v34, 0.0  ;;  %v955_v43 = vmax.f32 %v801_v35, 0.0 }
 0x180   : > { %v954_v45 = vmax.f32 %v610_v39, 0.0  ;;  %v956_v46 = vmax.f32 %v803_v40, 0.0 }
 0x181   : > { %v1321_v47 = vpack.c.bf16 %v953_v42, %v949_v41  ;;  %v1323_v48 = vpack.c.bf16 %v955_v43, %v951_v33 }
 0x182   : > { %v1322_v49 = vpack.c.bf16 %v954_v45, %v950_v44  ;;  %v1324_v52 = vpack.c.bf16 %v956_v46, %v952_v38  ;;  %v613_v53 = vpop.f32.mrb[16].mxu0  ;;  %v806_v54 = vpop.f32.mrb[16].mxu1 }
 0x183   : > { %v614_v55 = vadd.f32 %v613_v53, %v3554_v56  ;;  %v807_v0 = vadd.f32 %v806_v54, %v3556_v57  ;;  %v615_v60 = vpop.f32.mrb[17].mxu0  ;;  %v808_v61 = vpop.f32.mrb[17].mxu1 }
 0x184   : > { %v616_v62 = vadd.f32 %v615_v60, %v3558_v58  ;;  %v809_v63 = vadd.f32 %v808_v61, %v3560_v59  ;;  %v617_v1 = vpop.f32.mrb[18].mxu0  ;;  %v810_v2 = vpop.f32.mrb[18].mxu1  ;;  %1692 = vmatprep.mubr.bf16.mxu0 %v1322_v49  ;;  %1853 = vmatprep.mubr.bf16.mxu1 %v1324_v52 }
 0x185   : > { %v959_v3 = vmax.f32 %v807_v0, 0.0  ;;  %v618_v4 = vadd.f32 %v617_v1, %v3554_v56  ;;  %v811_v5 = vadd.f32 %v810_v2, %v3556_v57  ;;  %v619_v6 = vpop.f32.mrb[19].mxu0  ;;  %v812_v7 = vpop.f32.mrb[19].mxu1  ;;  %1693 = vmatmul.mubr.bf16.gmra.mrb[76].mxu0 %v1321_v47  ;;  %1854 = vmatmul.mubr.bf16.gmra.mrb[76].mxu1 %v1323_v48  ;;  %v957_v11 = vmax.f32 %v614_v55, 0.0 }
 0x186   : > { %v960_v8 = vmax.f32 %v809_v63, 0.0  ;;  %v620_v9 = vadd.f32 %v619_v6, %v3558_v58  ;;  %v813_v10 = vadd.f32 %v812_v7, %v3560_v59  ;;  %v958_v14 = vmax.f32 %v616_v62, 0.0 }
 0x187   : > { %v961_v12 = vmax.f32 %v618_v4, 0.0  ;;  %v963_v13 = vmax.f32 %v811_v5, 0.0 }
 0x188   : > { %v962_v15 = vmax.f32 %v620_v9, 0.0  ;;  %v964_v16 = vmax.f32 %v813_v10, 0.0 }
 0x189   : > { %v1325_v17 = vpack.c.bf16 %v961_v12, %v957_v11  ;;  %v1327_v18 = vpack.c.bf16 %v963_v13, %v959_v3 }
 0x18a   : > { %v1326_v19 = vpack.c.bf16 %v962_v15, %v958_v14  ;;  %v1328_v20 = vpack.c.bf16 %v964_v16, %v960_v8  ;;  %v623_v21 = vpop.f32.mrb[20].mxu0  ;;  %v816_v22 = vpop.f32.mrb[20].mxu1 }
 0x18b   : > { %v624_v23 = vadd.f32 %v623_v21, %v3554_v56  ;;  %v817_v24 = vadd.f32 %v816_v22, %v3556_v57  ;;  %v625_v25 = vpop.f32.mrb[21].mxu0  ;;  %v818_v26 = vpop.f32.mrb[21].mxu1 }
 0x18c   : > { %v626_v27 = vadd.f32 %v625_v25, %v3558_v58  ;;  %v819_v28 = vadd.f32 %v818_v26, %v3560_v59  ;;  %v627_v29 = vpop.f32.mrb[22].mxu0  ;;  %v820_v30 = vpop.f32.mrb[22].mxu1  ;;  %1700 = vmatprep.mubr.bf16.mxu0 %v1326_v19  ;;  %1861 = vmatprep.mubr.bf16.mxu1 %v1328_v20 }
 0x18d   : > { %v967_v31 = vmax.f32 %v817_v24, 0.0  ;;  %v628_v32 = vadd.f32 %v627_v29, %v3554_v56  ;;  %v821_v33 = vadd.f32 %v820_v30, %v3556_v57  ;;  %v629_v34 = vpop.f32.mrb[23].mxu0  ;;  %v822_v35 = vpop.f32.mrb[23].mxu1  ;;  %1701 = vmatmul.mubr.bf16.gmra.mrb[80].mxu0 %v1325_v17  ;;  %1862 = vmatmul.mubr.bf16.gmra.mrb[80].mxu1 %v1327_v18  ;;  %v965_v39 = vmax.f32 %v624_v23, 0.0 }
 0x18e   : > { %v968_v36 = vmax.f32 %v819_v28, 0.0  ;;  %v630_v37 = vadd.f32 %v629_v34, %v3558_v58  ;;  %v823_v38 = vadd.f32 %v822_v35, %v3560_v59  ;;  %v966_v42 = vmax.f32 %v626_v27, 0.0 }
 0x18f   : > { %v969_v40 = vmax.f32 %v628_v32, 0.0  ;;  %v971_v41 = vmax.f32 %v821_v33, 0.0 }
 0x190   : > { %v970_v43 = vmax.f32 %v630_v37, 0.0  ;;  %v972_v44 = vmax.f32 %v823_v38, 0.0 }
 0x191   : > { %v1329_v45 = vpack.c.bf16 %v969_v40, %v965_v39  ;;  %v1331_v46 = vpack.c.bf16 %v971_v41, %v967_v31 }
 0x192   : > { %v1330_v47 = vpack.c.bf16 %v970_v43, %v966_v42  ;;  %v1332_v48 = vpack.c.bf16 %v972_v44, %v968_v36  ;;  %v633_v49 = vpop.f32.mrb[24].mxu0  ;;  %v826_v52 = vpop.f32.mrb[24].mxu1 }
 0x193   : > { %v634_v53 = vadd.f32 %v633_v49, %v3554_v56  ;;  %v827_v54 = vadd.f32 %v826_v52, %v3556_v57  ;;  %v635_v55 = vpop.f32.mrb[25].mxu0  ;;  %v828_v0 = vpop.f32.mrb[25].mxu1 }
 0x194   : > { %v636_v60 = vadd.f32 %v635_v55, %v3558_v58  ;;  %v829_v61 = vadd.f32 %v828_v0, %v3560_v59  ;;  %v637_v62 = vpop.f32.mrb[26].mxu0  ;;  %v830_v63 = vpop.f32.mrb[26].mxu1  ;;  %1708 = vmatprep.mubr.bf16.mxu0 %v1330_v47  ;;  %1869 = vmatprep.mubr.bf16.mxu1 %v1332_v48 }
 0x195   : > { %v975_v1 = vmax.f32 %v827_v54, 0.0  ;;  %v638_v2 = vadd.f32 %v637_v62, %v3554_v56  ;;  %v831_v3 = vadd.f32 %v830_v63, %v3556_v57  ;;  %v639_v4 = vpop.f32.mrb[27].mxu0  ;;  %v832_v5 = vpop.f32.mrb[27].mxu1  ;;  %1709 = vmatmul.mubr.bf16.gmra.mrb[84].mxu0 %v1329_v45  ;;  %1870 = vmatmul.mubr.bf16.gmra.mrb[84].mxu1 %v1331_v46  ;;  %v973_v9 = vmax.f32 %v634_v53, 0.0 }
 0x196   : > { %v976_v6 = vmax.f32 %v829_v61, 0.0  ;;  %v640_v7 = vadd.f32 %v639_v4, %v3558_v58  ;;  %v833_v8 = vadd.f32 %v832_v5, %v3560_v59  ;;  %v974_v12 = vmax.f32 %v636_v60, 0.0 }
 0x197   : > { %v977_v10 = vmax.f32 %v638_v2, 0.0  ;;  %v979_v11 = vmax.f32 %v831_v3, 0.0 }
 0x198   : > { %v978_v13 = vmax.f32 %v640_v7, 0.0  ;;  %v980_v14 = vmax.f32 %v833_v8, 0.0 }
 0x199   : > { %v1333_v15 = vpack.c.bf16 %v977_v10, %v973_v9  ;;  %v1335_v16 = vpack.c.bf16 %v979_v11, %v975_v1 }
 0x19a   : > { %v1334_v17 = vpack.c.bf16 %v978_v13, %v974_v12  ;;  %v1336_v18 = vpack.c.bf16 %v980_v14, %v976_v6  ;;  %v643_v19 = vpop.f32.mrb[28].mxu0  ;;  %v836_v20 = vpop.f32.mrb[28].mxu1 }
 0x19b   : > { %v644_v21 = vadd.f32 %v643_v19, %v3554_v56  ;;  %v837_v22 = vadd.f32 %v836_v20, %v3556_v57  ;;  %v645_v23 = vpop.f32.mrb[29].mxu0  ;;  %v838_v24 = vpop.f32.mrb[29].mxu1 }
 0x19c   : > { %v646_v25 = vadd.f32 %v645_v23, %v3558_v58  ;;  %v839_v26 = vadd.f32 %v838_v24, %v3560_v59  ;;  %v647_v27 = vpop.f32.mrb[30].mxu0  ;;  %v840_v28 = vpop.f32.mrb[30].mxu1  ;;  %1716 = vmatprep.mubr.bf16.mxu0 %v1334_v17  ;;  %1877 = vmatprep.mubr.bf16.mxu1 %v1336_v18 }
 0x19d   : > { %v983_v29 = vmax.f32 %v837_v22, 0.0  ;;  %v648_v30 = vadd.f32 %v647_v27, %v3554_v56  ;;  %v841_v31 = vadd.f32 %v840_v28, %v3556_v57  ;;  %v649_v32 = vpop.f32.mrb[31].mxu0  ;;  %v842_v33 = vpop.f32.mrb[31].mxu1  ;;  %1717 = vmatmul.mubr.bf16.gmra.mrb[88].mxu0 %v1333_v15  ;;  %1878 = vmatmul.mubr.bf16.gmra.mrb[88].mxu1 %v1335_v16  ;;  %v981_v37 = vmax.f32 %v644_v21, 0.0 }
 0x19e   : > { %v984_v34 = vmax.f32 %v839_v26, 0.0  ;;  %v650_v35 = vadd.f32 %v649_v32, %v3558_v58  ;;  %v843_v36 = vadd.f32 %v842_v33, %v3560_v59  ;;  %v982_v40 = vmax.f32 %v646_v25, 0.0 }
 0x19f   : > { %v985_v38 = vmax.f32 %v648_v30, 0.0  ;;  %v987_v39 = vmax.f32 %v841_v31, 0.0 }
 0x1a0   : > { %v986_v41 = vmax.f32 %v650_v35, 0.0  ;;  %v988_v42 = vmax.f32 %v843_v36, 0.0 }
 0x1a1   : > { %v1337_v43 = vpack.c.bf16 %v985_v38, %v981_v37  ;;  %v1339_v44 = vpack.c.bf16 %v987_v39, %v983_v29 }
 0x1a2   : > { %v1338_v45 = vpack.c.bf16 %v986_v41, %v982_v40  ;;  %v1340_v46 = vpack.c.bf16 %v988_v42, %v984_v34  ;;  %v653_v47 = vpop.f32.mrb[32].mxu0  ;;  %v846_v48 = vpop.f32.mrb[32].mxu1 }
 0x1a3   : > { %v654_v49 = vadd.f32 %v653_v47, %v3554_v56  ;;  %v847_v52 = vadd.f32 %v846_v48, %v3556_v57  ;;  %v655_v53 = vpop.f32.mrb[33].mxu0  ;;  %v848_v54 = vpop.f32.mrb[33].mxu1 }
 0x1a4   : > { %v656_v55 = vadd.f32 %v655_v53, %v3558_v58  ;;  %v849_v0 = vadd.f32 %v848_v54, %v3560_v59  ;;  %v657_v60 = vpop.f32.mrb[34].mxu0  ;;  %v850_v61 = vpop.f32.mrb[34].mxu1  ;;  %1724 = vmatprep.mubr.bf16.mxu0 %v1338_v45  ;;  %1885 = vmatprep.mubr.bf16.mxu1 %v1340_v46 }
 0x1a5   : > { %v991_v62 = vmax.f32 %v847_v52, 0.0  ;;  %v658_v63 = vadd.f32 %v657_v60, %v3554_v56  ;;  %v851_v1 = vadd.f32 %v850_v61, %v3556_v57  ;;  %v659_v2 = vpop.f32.mrb[35].mxu0  ;;  %v852_v3 = vpop.f32.mrb[35].mxu1  ;;  %1725 = vmatmul.mubr.bf16.gmra.mrb[92].mxu0 %v1337_v43  ;;  %1886 = vmatmul.mubr.bf16.gmra.mrb[92].mxu1 %v1339_v44  ;;  %v989_v7 = vmax.f32 %v654_v49, 0.0 }
 0x1a6   : > { %v992_v4 = vmax.f32 %v849_v0, 0.0  ;;  %v660_v5 = vadd.f32 %v659_v2, %v3558_v58  ;;  %v853_v6 = vadd.f32 %v852_v3, %v3560_v59  ;;  %v990_v10 = vmax.f32 %v656_v55, 0.0 }
 0x1a7   : > { %v993_v8 = vmax.f32 %v658_v63, 0.0  ;;  %v995_v9 = vmax.f32 %v851_v1, 0.0 }
 0x1a8   : > { %v994_v11 = vmax.f32 %v660_v5, 0.0  ;;  %v996_v12 = vmax.f32 %v853_v6, 0.0 }
 0x1a9   : > { %v1341_v13 = vpack.c.bf16 %v993_v8, %v989_v7  ;;  %v1343_v14 = vpack.c.bf16 %v995_v9, %v991_v62 }
 0x1aa   : > { %v1342_v15 = vpack.c.bf16 %v994_v11, %v990_v10  ;;  %v1344_v16 = vpack.c.bf16 %v996_v12, %v992_v4  ;;  %v663_v17 = vpop.f32.mrb[36].mxu0  ;;  %v856_v18 = vpop.f32.mrb[36].mxu1 }
 0x1ab   : > { %v664_v19 = vadd.f32 %v663_v17, %v3554_v56  ;;  %v857_v20 = vadd.f32 %v856_v18, %v3556_v57  ;;  %v665_v21 = vpop.f32.mrb[37].mxu0  ;;  %v858_v22 = vpop.f32.mrb[37].mxu1 }
 0x1ac   : > { %v666_v23 = vadd.f32 %v665_v21, %v3558_v58  ;;  %v859_v24 = vadd.f32 %v858_v22, %v3560_v59  ;;  %v667_v25 = vpop.f32.mrb[38].mxu0  ;;  %v860_v26 = vpop.f32.mrb[38].mxu1  ;;  %1732 = vmatprep.mubr.bf16.mxu0 %v1342_v15  ;;  %1893 = vmatprep.mubr.bf16.mxu1 %v1344_v16 }
 0x1ad   : > { %v999_v27 = vmax.f32 %v857_v20, 0.0  ;;  %v668_v28 = vadd.f32 %v667_v25, %v3554_v56  ;;  %v861_v29 = vadd.f32 %v860_v26, %v3556_v57  ;;  %v669_v30 = vpop.f32.mrb[39].mxu0  ;;  %v862_v31 = vpop.f32.mrb[39].mxu1  ;;  %1733 = vmatmul.mubr.bf16.gmra.mrb[96].mxu0 %v1341_v13  ;;  %1894 = vmatmul.mubr.bf16.gmra.mrb[96].mxu1 %v1343_v14  ;;  %v997_v35 = vmax.f32 %v664_v19, 0.0 }
 0x1ae   : > { %v1000_v32 = vmax.f32 %v859_v24, 0.0  ;;  %v670_v33 = vadd.f32 %v669_v30, %v3558_v58  ;;  %v863_v34 = vadd.f32 %v862_v31, %v3560_v59  ;;  %v998_v38 = vmax.f32 %v666_v23, 0.0 }
 0x1af   : > { %v1001_v36 = vmax.f32 %v668_v28, 0.0  ;;  %v1003_v37 = vmax.f32 %v861_v29, 0.0 }
 0x1b0   : > { %v1002_v39 = vmax.f32 %v670_v33, 0.0  ;;  %v1004_v40 = vmax.f32 %v863_v34, 0.0 }
 0x1b1   : > { %v1345_v41 = vpack.c.bf16 %v1001_v36, %v997_v35  ;;  %v1347_v42 = vpack.c.bf16 %v1003_v37, %v999_v27 }
 0x1b2   : > { %v1346_v43 = vpack.c.bf16 %v1002_v39, %v998_v38  ;;  %v1348_v44 = vpack.c.bf16 %v1004_v40, %v1000_v32  ;;  %v673_v45 = vpop.f32.mrb[40].mxu0  ;;  %v866_v46 = vpop.f32.mrb[40].mxu1 }
 0x1b3   : > { %v674_v47 = vadd.f32 %v673_v45, %v3554_v56  ;;  %v867_v48 = vadd.f32 %v866_v46, %v3556_v57  ;;  %v675_v49 = vpop.f32.mrb[41].mxu0  ;;  %v868_v52 = vpop.f32.mrb[41].mxu1 }
 0x1b4   : > { %v676_v53 = vadd.f32 %v675_v49, %v3558_v58  ;;  %v869_v54 = vadd.f32 %v868_v52, %v3560_v59  ;;  %v677_v55 = vpop.f32.mrb[42].mxu0  ;;  %v870_v0 = vpop.f32.mrb[42].mxu1  ;;  %1740 = vmatprep.mubr.bf16.mxu0 %v1346_v43  ;;  %1901 = vmatprep.mubr.bf16.mxu1 %v1348_v44 }
 0x1b5   : > { %v1007_v60 = vmax.f32 %v867_v48, 0.0  ;;  %v678_v61 = vadd.f32 %v677_v55, %v3554_v56  ;;  %v871_v62 = vadd.f32 %v870_v0, %v3556_v57  ;;  %v679_v63 = vpop.f32.mrb[43].mxu0  ;;  %v872_v1 = vpop.f32.mrb[43].mxu1  ;;  %1741 = vmatmul.mubr.bf16.gmra.mrb[100].mxu0 %v1345_v41  ;;  %1902 = vmatmul.mubr.bf16.gmra.mrb[100].mxu1 %v1347_v42  ;;  %v1005_v5 = vmax.f32 %v674_v47, 0.0 }
 0x1b6   : > { %v1008_v2 = vmax.f32 %v869_v54, 0.0  ;;  %v680_v3 = vadd.f32 %v679_v63, %v3558_v58  ;;  %v873_v4 = vadd.f32 %v872_v1, %v3560_v59  ;;  %v1006_v8 = vmax.f32 %v676_v53, 0.0 }
 0x1b7   : > { %v1009_v6 = vmax.f32 %v678_v61, 0.0  ;;  %v1011_v7 = vmax.f32 %v871_v62, 0.0 }
 0x1b8   : > { %v1010_v9 = vmax.f32 %v680_v3, 0.0  ;;  %v1012_v10 = vmax.f32 %v873_v4, 0.0 }
 0x1b9   : > { %v1349_v11 = vpack.c.bf16 %v1009_v6, %v1005_v5  ;;  %v1351_v12 = vpack.c.bf16 %v1011_v7, %v1007_v60 }
 0x1ba   : > { %v1350_v13 = vpack.c.bf16 %v1010_v9, %v1006_v8  ;;  %v1352_v14 = vpack.c.bf16 %v1012_v10, %v1008_v2  ;;  %v683_v15 = vpop.f32.mrb[44].mxu0  ;;  %v876_v16 = vpop.f32.mrb[44].mxu1 }
 0x1bb   : > { %v684_v17 = vadd.f32 %v683_v15, %v3554_v56  ;;  %v877_v18 = vadd.f32 %v876_v16, %v3556_v57  ;;  %v685_v19 = vpop.f32.mrb[45].mxu0  ;;  %v878_v20 = vpop.f32.mrb[45].mxu1 }
 0x1bc   : > { %v686_v21 = vadd.f32 %v685_v19, %v3558_v58  ;;  %v879_v22 = vadd.f32 %v878_v20, %v3560_v59  ;;  %v687_v23 = vpop.f32.mrb[46].mxu0  ;;  %v880_v24 = vpop.f32.mrb[46].mxu1  ;;  %1748 = vmatprep.mubr.bf16.mxu0 %v1350_v13  ;;  %1909 = vmatprep.mubr.bf16.mxu1 %v1352_v14 }
 0x1bd   : > { %v1015_v25 = vmax.f32 %v877_v18, 0.0  ;;  %v688_v26 = vadd.f32 %v687_v23, %v3554_v56  ;;  %v881_v27 = vadd.f32 %v880_v24, %v3556_v57  ;;  %v689_v28 = vpop.f32.mrb[47].mxu0  ;;  %v882_v29 = vpop.f32.mrb[47].mxu1  ;;  %1749 = vmatmul.mubr.bf16.gmra.mrb[104].mxu0 %v1349_v11  ;;  %1910 = vmatmul.mubr.bf16.gmra.mrb[104].mxu1 %v1351_v12  ;;  %v1013_v33 = vmax.f32 %v684_v17, 0.0 }
 0x1be   : > { %v1016_v30 = vmax.f32 %v879_v22, 0.0  ;;  %v690_v31 = vadd.f32 %v689_v28, %v3558_v58  ;;  %v883_v32 = vadd.f32 %v882_v29, %v3560_v59  ;;  %v1014_v36 = vmax.f32 %v686_v21, 0.0 }
 0x1bf   : > { %v1017_v34 = vmax.f32 %v688_v26, 0.0  ;;  %v1019_v35 = vmax.f32 %v881_v27, 0.0 }
 0x1c0   : > { %v1018_v37 = vmax.f32 %v690_v31, 0.0  ;;  %v1020_v38 = vmax.f32 %v883_v32, 0.0 }
 0x1c1   : > { %v1353_v39 = vpack.c.bf16 %v1017_v34, %v1013_v33  ;;  %v1355_v40 = vpack.c.bf16 %v1019_v35, %v1015_v25 }
 0x1c2   : > { %v1354_v41 = vpack.c.bf16 %v1018_v37, %v1014_v36  ;;  %v1356_v42 = vpack.c.bf16 %v1020_v38, %v1016_v30  ;;  %v693_v43 = vpop.f32.mrb[48].mxu0  ;;  %v886_v44 = vpop.f32.mrb[48].mxu1 }
 0x1c3   : > { %v694_v45 = vadd.f32 %v693_v43, %v3554_v56  ;;  %v887_v46 = vadd.f32 %v886_v44, %v3556_v57  ;;  %v695_v47 = vpop.f32.mrb[49].mxu0  ;;  %v888_v48 = vpop.f32.mrb[49].mxu1 }
 0x1c4   : > { %v696_v49 = vadd.f32 %v695_v47, %v3558_v58  ;;  %v889_v52 = vadd.f32 %v888_v48, %v3560_v59  ;;  %v697_v53 = vpop.f32.mrb[50].mxu0  ;;  %v890_v54 = vpop.f32.mrb[50].mxu1  ;;  %1756 = vmatprep.mubr.bf16.mxu0 %v1354_v41  ;;  %1917 = vmatprep.mubr.bf16.mxu1 %v1356_v42 }
 0x1c5   : > { %v1023_v55 = vmax.f32 %v887_v46, 0.0  ;;  %v698_v0 = vadd.f32 %v697_v53, %v3554_v56  ;;  %v891_v60 = vadd.f32 %v890_v54, %v3556_v57  ;;  %v699_v61 = vpop.f32.mrb[51].mxu0  ;;  %v892_v62 = vpop.f32.mrb[51].mxu1  ;;  %1757 = vmatmul.mubr.bf16.gmra.mrb[108].mxu0 %v1353_v39  ;;  %1918 = vmatmul.mubr.bf16.gmra.mrb[108].mxu1 %v1355_v40  ;;  %v1021_v3 = vmax.f32 %v694_v45, 0.0 }
 0x1c6   : > { %v1024_v63 = vmax.f32 %v889_v52, 0.0  ;;  %v700_v1 = vadd.f32 %v699_v61, %v3558_v58  ;;  %v893_v2 = vadd.f32 %v892_v62, %v3560_v59  ;;  %v1022_v6 = vmax.f32 %v696_v49, 0.0 }
 0x1c7   : > { %v1025_v4 = vmax.f32 %v698_v0, 0.0  ;;  %v1027_v5 = vmax.f32 %v891_v60, 0.0 }
 0x1c8   : > { %v1026_v7 = vmax.f32 %v700_v1, 0.0  ;;  %v1028_v8 = vmax.f32 %v893_v2, 0.0 }
 0x1c9   : > { %v1357_v9 = vpack.c.bf16 %v1025_v4, %v1021_v3  ;;  %v1359_v10 = vpack.c.bf16 %v1027_v5, %v1023_v55 }
 0x1ca   : > { %v1358_v11 = vpack.c.bf16 %v1026_v7, %v1022_v6  ;;  %v1360_v12 = vpack.c.bf16 %v1028_v8, %v1024_v63  ;;  %v703_v13 = vpop.f32.mrb[52].mxu0  ;;  %v896_v14 = vpop.f32.mrb[52].mxu1 }
 0x1cb   : > { %v704_v15 = vadd.f32 %v703_v13, %v3554_v56  ;;  %v897_v16 = vadd.f32 %v896_v14, %v3556_v57  ;;  %v705_v17 = vpop.f32.mrb[53].mxu0  ;;  %v898_v18 = vpop.f32.mrb[53].mxu1 }
 0x1cc   : > { %v706_v19 = vadd.f32 %v705_v17, %v3558_v58  ;;  %v899_v20 = vadd.f32 %v898_v18, %v3560_v59  ;;  %v707_v21 = vpop.f32.mrb[54].mxu0  ;;  %v900_v22 = vpop.f32.mrb[54].mxu1  ;;  %1764 = vmatprep.mubr.bf16.mxu0 %v1358_v11  ;;  %1925 = vmatprep.mubr.bf16.mxu1 %v1360_v12 }
 0x1cd   : > { %v1031_v23 = vmax.f32 %v897_v16, 0.0  ;;  %v708_v24 = vadd.f32 %v707_v21, %v3554_v56  ;;  %v901_v25 = vadd.f32 %v900_v22, %v3556_v57  ;;  %v709_v26 = vpop.f32.mrb[55].mxu0  ;;  %v902_v27 = vpop.f32.mrb[55].mxu1  ;;  %1765 = vmatmul.mubr.bf16.gmra.mrb[112].mxu0 %v1357_v9  ;;  %1926 = vmatmul.mubr.bf16.gmra.mrb[112].mxu1 %v1359_v10  ;;  %v1029_v31 = vmax.f32 %v704_v15, 0.0 }
 0x1ce   : > { %v1032_v28 = vmax.f32 %v899_v20, 0.0  ;;  %v710_v29 = vadd.f32 %v709_v26, %v3558_v58  ;;  %v903_v30 = vadd.f32 %v902_v27, %v3560_v59  ;;  %v1030_v34 = vmax.f32 %v706_v19, 0.0 }
 0x1cf   : > { %v1033_v32 = vmax.f32 %v708_v24, 0.0  ;;  %v1035_v33 = vmax.f32 %v901_v25, 0.0 }
 0x1d0   : > { %v1034_v35 = vmax.f32 %v710_v29, 0.0  ;;  %v1036_v36 = vmax.f32 %v903_v30, 0.0 }
 0x1d1   : > { %v1361_v37 = vpack.c.bf16 %v1033_v32, %v1029_v31  ;;  %v1363_v38 = vpack.c.bf16 %v1035_v33, %v1031_v23 }
 0x1d2   : > { %v1362_v39 = vpack.c.bf16 %v1034_v35, %v1030_v34  ;;  %v1364_v40 = vpack.c.bf16 %v1036_v36, %v1032_v28  ;;  %v713_v41 = vpop.f32.mrb[56].mxu0  ;;  %v906_v42 = vpop.f32.mrb[56].mxu1 }
 0x1d3   : > { %v714_v43 = vadd.f32 %v713_v41, %v3554_v56  ;;  %v907_v44 = vadd.f32 %v906_v42, %v3556_v57  ;;  %v715_v45 = vpop.f32.mrb[57].mxu0  ;;  %v908_v46 = vpop.f32.mrb[57].mxu1  ;;  %v1964_v41 = vadd.s32 32, %v3545_v51  ;;  %v1965_v42 = vadd.s32 40, %v3545_v51 }
 0x1d4   : > { %v716_v47 = vadd.f32 %v715_v45, %v3558_v58  ;;  %v909_v48 = vadd.f32 %v908_v46, %v3560_v59  ;;  %v717_v49 = vpop.f32.mrb[58].mxu0  ;;  %v910_v52 = vpop.f32.mrb[58].mxu1  ;;  %1772 = vmatprep.mubr.bf16.mxu0 %v1362_v39  ;;  %1933 = vmatprep.mubr.bf16.mxu1 %v1364_v40  ;;  %v1962_v39 = vadd.s32 16, %v3545_v51  ;;  %v1963_v40 = vadd.s32 24, %v3545_v51 }
 0x1d5   : > { %v1039_v53 = vmax.f32 %v907_v44, 0.0  ;;  %v718_v54 = vadd.f32 %v717_v49, %v3554_v56  ;;  %v911_v55 = vadd.f32 %v910_v52, %v3556_v57  ;;  %v719_v0 = vpop.f32.mrb[59].mxu0  ;;  %v912_v60 = vpop.f32.mrb[59].mxu1  ;;  %1773 = vmatmul.mubr.bf16.gmra.mrb[116].mxu0 %v1361_v37  ;;  %1934 = vmatmul.mubr.bf16.gmra.mrb[116].mxu1 %v1363_v38  ;;  %v1037_v1 = vmax.f32 %v714_v43, 0.0 }
 0x1d6   : > { %v1040_v61 = vmax.f32 %v909_v48, 0.0  ;;  %v720_v62 = vadd.f32 %v719_v0, %v3558_v58  ;;  %v913_v63 = vadd.f32 %v912_v60, %v3560_v59  ;;  %v1038_v4 = vmax.f32 %v716_v47, 0.0 }
 0x1d7   : > { %v1041_v2 = vmax.f32 %v718_v54, 0.0  ;;  %v1043_v3 = vmax.f32 %v911_v55, 0.0  ;;  %v3702_v43 = vand.u32 127, %v359_v50  ;;  %v1966_v47 = vadd.s32 48, %v3545_v51 }
 0x1d8   : > { %v1042_v5 = vmax.f32 %v720_v62, 0.0  ;;  %v1044_v6 = vmax.f32 %v913_v63, 0.0  ;;  %v3710_v54 = vstv %s2092_s17  ;;  %v1967_v60 = vadd.s32 56, %v3545_v51 }
 0x1d9   : > { %v1365_v7 = vpack.c.bf16 %v1041_v2, %v1037_v1  ;;  %v1367_v8 = vpack.c.bf16 %v1043_v3, %v1039_v53 }
 0x1da   : > { %v1366_v9 = vpack.c.bf16 %v1042_v5, %v1038_v4  ;;  %v1368_v10 = vpack.c.bf16 %v1044_v6, %v1040_v61  ;;  %v723_v11 = vpop.f32.mrb[60].mxu0  ;;  %v916_v12 = vpop.f32.mrb[60].mxu1 }
 0x1db   : > { %v724_v13 = vadd.f32 %v723_v11, %v3554_v56  ;;  %v917_v14 = vadd.f32 %v916_v12, %v3556_v57  ;;  %v725_v15 = vpop.f32.mrb[61].mxu0  ;;  %v918_v16 = vpop.f32.mrb[61].mxu1 }
 0x1dc   : > { %v726_v17 = vadd.f32 %v725_v15, %v3558_v58  ;;  %v919_v18 = vadd.f32 %v918_v16, %v3560_v59  ;;  %v727_v19 = vpop.f32.mrb[62].mxu0  ;;  %v920_v20 = vpop.f32.mrb[62].mxu1  ;;  %1780 = vmatprep.mubr.bf16.mxu0 %v1366_v9  ;;  %1941 = vmatprep.mubr.bf16.mxu1 %v1368_v10  ;;  %v1968_v10 = vadd.s32 64, %v3545_v51 }
 0x1dd   : > { %v1047_v21 = vmax.f32 %v917_v14, 0.0  ;;  %v728_v22 = vadd.f32 %v727_v19, %v3554_v56  ;;  %v921_v23 = vadd.f32 %v920_v20, %v3556_v57  ;;  %v729_v24 = vpop.f32.mrb[63].mxu0  ;;  %v922_v25 = vpop.f32.mrb[63].mxu1  ;;  %1781 = vmatmul.mubr.bf16.gmra.mrb[120].mxu0 %v1365_v7  ;;  %1942 = vmatmul.mubr.bf16.gmra.mrb[120].mxu1 %v1367_v8  ;;  %v1045_v29 = vmax.f32 %v724_v13, 0.0 }
 0x1de   : > { %v1048_v26 = vmax.f32 %v919_v18, 0.0  ;;  %v730_v27 = vadd.f32 %v729_v24, %v3558_v58  ;;  %v923_v28 = vadd.f32 %v922_v25, %v3560_v59  ;;  %v1046_v32 = vmax.f32 %v726_v17, 0.0 }
 0x1df   : > { %v1049_v30 = vmax.f32 %v728_v22, 0.0  ;;  %v1051_v31 = vmax.f32 %v921_v23, 0.0  ;;  %v3691_v58 = vstv %s2694_s15  ;;  %v1961_v59 = vadd.s32 8, %v3545_v51  ;;  %s3173_s15 = sshll.u32 %s3251_s30, 4  ;;  %s3174_s15 = int_to_ptr.vmem [resolvable:$false] %s3173_s15 }
 0x1e0   : > { %v1050_v33 = vmax.f32 %v730_v27, 0.0  ;;  %v1052_v34 = vmax.f32 %v923_v28, 0.0  ;;  %v1993_v37 = vadd.s32 %v3691_v58, %v3545_v51  ;;  %v1995_v46 = vadd.s32 %v3691_v58, %v1962_v39  ;;  %s3175_s8 = scalar_lea.vmem %s3174_s15, 8192  ;;  %p3176_p5 = scmp.lt.s32.totalorder %s4178_s20, %s3174_s15 }
 0x1e1   : > { %v1369_v35 = vpack.c.bf16 %v1049_v30, %v1045_v29  ;;  %v1371_v56 = vpack.c.bf16 %v1051_v31, %v1047_v21  ;;  %v1994_v38 = vadd.s32 %v3691_v58, %v1961_v59  ;;  %v1996_v48 = vadd.s32 %v3691_v58, %v1963_v40  ;;  %p3177_p9 = scmp.lt.s32.totalorder %s3175_s8, %s3169_s28 }
 0x1e2   : > { %v1370_v36 = vpack.c.bf16 %v1050_v33, %v1046_v32  ;;  %v1372_v57 = vpack.c.bf16 %v1052_v34, %v1048_v26  ;;  %v2027_v44 = vmul.u32 128, %v1993_v37  ;;  %v1997_v49 = vadd.s32 %v3691_v58, %v1964_v41 }
 0x1e3   : > { %v2028_v45 = vmul.u32 128, %v1994_v38  ;;  %v1998_v52 = vadd.s32 %v3691_v58, %v1965_v42  ;;  %v2029_v55 = vmul.u32 128, %v1995_v46  ;;  %v1999_v0 = vadd.s32 %v3691_v58, %v1966_v47  ;;  %p3178_p12 = por %p3177_p9, %p3176_p5 }
 0x1e4   : > { %1788 = vmatprep.mubr.bf16.mxu0 %v1370_v36  ;;  %1949 = vmatprep.mubr.bf16.mxu1 %v1372_v57  ;;  %v2059_v53 = vadd.s32 %v2027_v44, %v3702_v43  ;;  %v2030_v61 = vmul.u32 128, %v1996_v48  ;;  %v2031_v62 = vmul.u32 128, %v1997_v49  ;;  %v2000_v5 = vadd.s32 %v3691_v58, %v1967_v60 }
 0x1e5   : > { %1789 = vmatmul.mubr.bf16.gmra.mrb[124].mxu0 %v1369_v35  ;;  %1950 = vmatmul.mubr.bf16.gmra.mrb[124].mxu1 %v1371_v56  ;;  %v2060_v50 = vadd.s32 %v2028_v45, %v3702_v43  ;;  %v2032_v63 = vmul.u32 128, %v1998_v52  ;;  %v2061_v3 = vadd.s32 %v2029_v55, %v3702_v43  ;;  %v2033_v4 = vmul.u32 128, %v1999_v0  ;;  %p3179_p2 = pnand %p3178_p12, %p3172_p3 }
 0x1e6   : > { %v2094_v1 = vxor.u32 %v3710_v54, %v2059_v53  ;;  %v2062_v6 = vadd.s32 %v2030_v61, %v3702_v43  ;;  %v2063_v7 = vadd.s32 %v2031_v62, %v3702_v43  ;;  %v2034_v14 = vmul.u32 128, %v2000_v5 }
 0x1e7   : > { %v2095_v2 = vxor.u32 %v3710_v54, %v2060_v50  ;;  %v2064_v8 = vadd.s32 %v2032_v63, %v3702_v43  ;;  %v2096_v12 = vxor.u32 %v3710_v54, %v2061_v3  ;;  %v2065_v13 = vadd.s32 %v2033_v4, %v3702_v43 }
 0x1e8   : > { %v2126_v9 = vshrl.u32 %v2094_v1, 16  ;;  %v2097_v15 = vxor.u32 %v3710_v54, %v2062_v6  ;;  %v2098_v16 = vxor.u32 %v3710_v54, %v2063_v7  ;;  %v1969_v17 = vadd.s32 72, %v3545_v51 }
 0x1e9   : > { %v2127_v11 = vshrl.u32 %v2095_v2, 16  ;;  %v2099_v18 = vxor.u32 %v3710_v54, %v2064_v8  ;;  %v2001_v20 = vadd.s32 %v3691_v58, %v1968_v10  ;;  %v1970_v21 = vadd.s32 80, %v3545_v51 }
 0x1ea   : > { %v2158_v19 = vxor.u32 %v2126_v9, %v2094_v1  ;;  %v2128_v23 = vshrl.u32 %v2096_v12, 16  ;;  %v2100_v24 = vxor.u32 %v3710_v54, %v2065_v13  ;;  %v2066_v25 = vadd.s32 %v2034_v14, %v3702_v43 }
 0x1eb   : > { %v2159_v22 = vxor.u32 %v2127_v11, %v2095_v2  ;;  %v2129_v26 = vshrl.u32 %v2097_v15, 16  ;;  %v2130_v27 = vshrl.u32 %v2098_v16, 16  ;;  %v2002_v28 = vadd.s32 %v3691_v58, %v1969_v17 }
 0x1ec   : > { %v2131_v29 = vshrl.u32 %v2099_v18, 16  ;;  %v1971_v30 = vadd.s32 88, %v3545_v51  ;;  %v2190_v31 = vmul.u32 2146121005, %v2158_v19  ;;  %v2035_v32 = vmul.u32 128, %v2001_v20 }
 0x1ed   : > { %v2003_v33 = vadd.s32 %v3691_v58, %v1970_v21  ;;  %v2191_v34 = vmul.u32 2146121005, %v2159_v22  ;;  %v2160_v35 = vxor.u32 %v2128_v23, %v2096_v12  ;;  %v2132_v56 = vshrl.u32 %v2100_v24, 16 }
 0x1ee   : > { %v2101_v36 = vxor.u32 %v3710_v54, %v2066_v25  ;;  %v2161_v57 = vxor.u32 %v2129_v26, %v2097_v15  ;;  %v2162_v59 = vxor.u32 %v2130_v27, %v2098_v16  ;;  %v2036_v37 = vmul.u32 128, %v2002_v28 }
 0x1ef   : > { %v2163_v38 = vxor.u32 %v2131_v29, %v2099_v18  ;;  %v2004_v39 = vadd.s32 %v3691_v58, %v1971_v30  ;;  %v2222_v40 = vshrl.u32 %v2190_v31, 15  ;;  %v2067_v41 = vadd.s32 %v2035_v32, %v3702_v43 }
 0x1f0   : > { %v2037_v42 = vmul.u32 128, %v2003_v33  ;;  %v2223_v44 = vshrl.u32 %v2191_v34, 15  ;;  %v2192_v45 = vmul.u32 2146121005, %v2160_v35  ;;  %v2164_v46 = vxor.u32 %v2132_v56, %v2100_v24 }
 0x1f1   : > { %v2133_v47 = vshrl.u32 %v2101_v36, 16  ;;  %v2193_v48 = vmul.u32 2146121005, %v2161_v57  ;;  %v2194_v49 = vmul.u32 2146121005, %v2162_v59  ;;  %v2068_v52 = vadd.s32 %v2036_v37, %v3702_v43 }
 0x1f2   : > { %v2195_v53 = vmul.u32 2146121005, %v2163_v38  ;;  %v2038_v50 = vmul.u32 128, %v2004_v39  ;;  %v2254_v55 = vxor.u32 %v2222_v40, %v2190_v31  ;;  %v2102_v0 = vxor.u32 %v3710_v54, %v2067_v41 }
 0x1f3   : > { %v2069_v60 = vadd.s32 %v2037_v42, %v3702_v43  ;;  %v1972_v61 = vadd.s32 96, %v3545_v51  ;;  %v2255_v62 = vxor.u32 %v2223_v44, %v2191_v34  ;;  %v2224_v63 = vshrl.u32 %v2192_v45, 15 }
 0x1f4   : > { %v2196_v1 = vmul.u32 2146121005, %v2164_v46  ;;  %v2165_v2 = vxor.u32 %v2133_v47, %v2101_v36  ;;  %v2225_v3 = vshrl.u32 %v2193_v48, 15  ;;  %v2103_v4 = vxor.u32 %v3710_v54, %v2068_v52 }
 0x1f5   : > { %v2226_v5 = vshrl.u32 %v2194_v49, 15  ;;  %v2227_v6 = vshrl.u32 %v2195_v53, 15  ;;  %v2070_v7 = vadd.s32 %v2038_v50, %v3702_v43  ;;  %v2286_v8 = vmul.u32 2221713035, %v2254_v55 }
 0x1f6   : > { %v2134_v9 = vshrl.u32 %v2102_v0, 16  ;;  %v2104_v10 = vxor.u32 %v3710_v54, %v2069_v60  ;;  %v2005_v11 = vadd.s32 %v3691_v58, %v1972_v61  ;;  %v2287_v12 = vmul.u32 2221713035, %v2255_v62 }
 0x1f7   : > { %v2256_v13 = vxor.u32 %v2224_v63, %v2192_v45  ;;  %v2228_v14 = vshrl.u32 %v2196_v1, 15  ;;  %v2197_v15 = vmul.u32 2146121005, %v2165_v2  ;;  %v2257_v16 = vxor.u32 %v2225_v3, %v2193_v48 }
 0x1f8   : > { %v2135_v17 = vshrl.u32 %v2103_v4, 16  ;;  %v1973_v18 = vadd.s32 104, %v3545_v51  ;;  %v2258_v19 = vxor.u32 %v2226_v5, %v2194_v49  ;;  %v2259_v20 = vxor.u32 %v2227_v6, %v2195_v53 }
 0x1f9   : > { %v2105_v21 = vxor.u32 %v3710_v54, %v2070_v7  ;;  %v2318_v22 = vshrl.u32 %v2286_v8, 16  ;;  %v2166_v23 = vxor.u32 %v2134_v9, %v2102_v0  ;;  %v2136_v24 = vshrl.u32 %v2104_v10, 16 }
 0x1fa   : > { %v2039_v25 = vmul.u32 128, %v2005_v11  ;;  %v2319_v26 = vshrl.u32 %v2287_v12, 16  ;;  %v2288_v27 = vmul.u32 2221713035, %v2256_v13  ;;  %v2260_v28 = vxor.u32 %v2228_v14, %v2196_v1 }
 0x1fb   : > { %v2229_v29 = vshrl.u32 %v2197_v15, 15  ;;  %v2289_v30 = vmul.u32 2221713035, %v2257_v16  ;;  %v2167_v31 = vxor.u32 %v2135_v17, %v2103_v4  ;;  %v2006_v32 = vadd.s32 %v3691_v58, %v1973_v18 }
 0x1fc   : > { %v1974_v33 = vadd.s32 112, %v3545_v51  ;;  %v2290_v34 = vmul.u32 2221713035, %v2258_v19  ;;  %v2291_v35 = vmul.u32 2221713035, %v2259_v20  ;;  %v2137_v56 = vshrl.u32 %v2105_v21, 16 }
 0x1fd   : > { %v2198_v36 = vmul.u32 2146121005, %v2166_v23  ;;  %v3751_v57 = vxor.u32 %v2136_v24, %v2104_v10  ;;  %v2071_v59 = vadd.s32 %v2039_v25, %v3702_v43  ;;  %v3754_v37 = vxor.u32 %v2318_v22, %v2286_v8  ;;  %v3775_v8 = vld [vmem:[%s4229_s5] ss:$0 sm:$0xff] }
 0x1fe   : > { %v3756_v38 = vxor.u32 %v2319_v26, %v2287_v12  ;;  %v2292_v39 = vmul.u32 2221713035, %v2260_v28  ;;  %v2261_v40 = vxor.u32 %v2229_v29, %v2197_v15  ;;  %v2320_v41 = vshrl.u32 %v2288_v27, 16 }
 0x1ff   : > { %v2199_v42 = vmul.u32 2146121005, %v2167_v31  ;;  %v2040_v44 = vmul.u32 128, %v2006_v32  ;;  %v2007_v45 = vadd.s32 %v3691_v58, %v1974_v33  ;;  %v2321_v46 = vshrl.u32 %v2289_v30, 16 }
 0x200   : > { %v2322_v47 = vshrl.u32 %v2290_v34, 16  ;;  %v2323_v48 = vshrl.u32 %v2291_v35, 16  ;;  %v2169_v49 = vxor.u32 %v2137_v56, %v2105_v21  ;;  %v2230_v52 = vshrl.u32 %v2198_v36, 15 }
 0x201   : > { %v2200_v53 = vmul.u32 2146121005, %v3751_v57  ;;  %v2106_v50 = vxor.u32 %v3710_v54, %v2071_v59  ;;  %v1975_v55 = vadd.s32 120, %v3545_v51  ;;  %v2324_v0 = vshrl.u32 %v2292_v39, 16 }
 0x202   : > { %v2293_v60 = vmul.u32 2221713035, %v2261_v40  ;;  %vm2382_vm0 = vcmp.lt.u32.totalorder %v3754_v37, 3435973837  ;;  %v3763_v61 = vxor.u32 %v2320_v41, %v2288_v27  ;;  %v2231_v62 = vshrl.u32 %v2199_v42, 15 }
 0x203   : > { %v2072_v63 = vadd.s32 %v2040_v44, %v3702_v43  ;;  %v2041_v1 = vmul.u32 128, %v2007_v45  ;;  %v3766_v4 = vxor.u32 %v2321_v46, %v2289_v30  ;;  %v3768_v5 = vxor.u32 %v2322_v47, %v2290_v34 }
 0x204   : > { %v3770_v6 = vxor.u32 %v2323_v48, %v2291_v35  ;;  %v2201_v7 = vmul.u32 2146121005, %v2169_v49  ;;  %vm2383_vm1 = vcmp.lt.u32.totalorder %v3756_v38, 3435973837  ;;  %v3778_v11 = vxor.u32 %v2230_v52, %v2198_v36 }
 0x205   : > { %v2232_v12 = vshrl.u32 %v2200_v53, 15  ;;  %v2138_v13 = vshrl.u32 %v2106_v50, 16  ;;  %v2008_v14 = vadd.s32 %v3691_v58, %v1975_v55  ;;  %v3781_v19 = vxor.u32 %v2324_v0, %v2292_v39 }
 0x206   : > { %v2325_v20 = vshrl.u32 %v2293_v60, 16  ;;  %v3783_v23 = vxor.u32 %v2231_v62, %v2199_v42  ;;  %v2107_v24 = vxor.u32 %v3710_v54, %v2072_v63  ;;  %v2073_v25 = vadd.s32 %v2041_v1, %v3702_v43 }
 0x207   : > { %v1976_v26 = vadd.s32 128, %v3545_v51  ;;  %v2233_v30 = vshrl.u32 %v2201_v7, 15  ;;  %v2294_v31 = vmul.u32 2221713035, %v3778_v11  ;;  %v3790_v32 = vxor.u32 %v2138_v13, %v2106_v50 }
 0x208   : > { %v2042_v33 = vmul.u32 128, %v2008_v14  ;;  %v1977_v34 = vadd.s32 136, %v3545_v51  ;;  %v3794_v36 = vxor.u32 %v2325_v20, %v2293_v60  ;;  %v3796_v57 = vxor.u32 %v2232_v12, %v2200_v53 }
 0x209   : > { %vm2384_vm2 = vcmp.lt.u32.totalorder %v3763_v61, 3435973837  ;;  %v2139_v59 = vshrl.u32 %v2107_v24, 16  ;;  %v2108_v39 = vxor.u32 %v3710_v54, %v2073_v25  ;;  %v2009_v40 = vadd.s32 %v3691_v58, %v1976_v26 }
 0x20a   : > { %v1978_v41 = vadd.s32 144, %v3545_v51  ;;  %v2295_v47 = vmul.u32 2221713035, %v3783_v23  ;;  %v3803_v48 = vxor.u32 %v2233_v30, %v2201_v7  ;;  %vm2385_vm3 = vcmp.lt.u32.totalorder %v3766_v4, 3435973837 }
 0x20b   : > { %v2202_v53 = vmul.u32 2146121005, %v3790_v32  ;;  %v2074_v50 = vadd.s32 %v2042_v33, %v3702_v43  ;;  %v2010_v55 = vadd.s32 %v3691_v58, %v1977_v34  ;;  %v1979_v0 = vadd.s32 152, %v3545_v51 }
 0x20c   : > { %v2140_v12 = vshrl.u32 %v2108_v39, 16  ;;  %v2043_v13 = vmul.u32 128, %v2009_v40  ;;  %v2011_v37 = vadd.s32 %v3691_v58, %v1978_v41  ;;  %v2326_v26 = vshrl.u32 %v2294_v31, 16 }
 0x20d   : > { %v2109_v20 = vxor.u32 %v3710_v54, %v2074_v50  ;;  %v2296_v38 = vmul.u32 2221713035, %v3796_v57  ;;  %vm2386_vm4 = vcmp.lt.u32.totalorder %v3768_v5, 3435973837  ;;  %vm2387_vm5 = vcmp.lt.u32.totalorder %v3770_v6, 3435973837 }
 0x20e   : > { %v2045_v30 = vmul.u32 128, %v2011_v37  ;;  %vm2388_vm6 = vcmp.lt.u32.totalorder %v3781_v19, 3435973837  ;;  %vm2389_vm7 = vcmp.lt.u32.totalorder %v3794_v36, 3435973837 }
 0x240   : > { %v2718_v2 = vpop.f32.mrb[64].mxu0  ;;  %v2830_v3 = vpop.f32.mrb[64].mxu1 }
 0x241   : > { %v2719_v9 = vpop.f32.mrb[65].mxu0  ;;  %v2831_v10 = vpop.f32.mrb[65].mxu1 }
 0x242   : > { %v2720_v15 = vadd.f32 %v2719_v9, %v2718_v2  ;;  %v2832_v16 = vadd.f32 %v2831_v10, %v2830_v3  ;;  %v2721_v17 = vpop.f32.mrb[66].mxu0  ;;  %v2833_v18 = vpop.f32.mrb[66].mxu1  ;;  %v3817_v10 = vxor.u32 %v2139_v59, %v2107_v24  ;;  %v2297_v59 = vmul.u32 2221713035, %v3803_v48 }
 0x243   : > { %v2722_v21 = vpop.f32.mrb[67].mxu0  ;;  %v2834_v22 = vpop.f32.mrb[67].mxu1 }
 0x244   : > { %v1671_v27 = vadd.f32 %v2720_v15, %v3775_v8  ;;  %v2723_v28 = vadd.f32 %v2722_v21, %v2721_v17  ;;  %v2835_v29 = vadd.f32 %v2834_v22, %v2833_v18  ;;  %v2234_v18 = vshrl.u32 %v2202_v53, 15 }
 0x245   : > { %v2044_v21 = vmul.u32 128, %v2010_v55  ;;  %v2012_v22 = vadd.s32 %v3691_v58, %v1979_v0  ;;  %v2329_v6 = vshrl.u32 %v2297_v59, 16 }
 0x246   : > { %v1832_v35 = vadd.f32 %v2832_v16, %v1671_v27  ;;  %v1674_v56 = vadd.f32 %v2723_v28, %v3775_v8  ;;  %v2203_v27 = vmul.u32 2146121005, %v3817_v10  ;;  %v3832_v28 = vxor.u32 %v2140_v12, %v2108_v39 }
 0x247   : > { %v2141_v39 = vshrl.u32 %v2109_v20, 16  ;;  %v3854_v10 = vxor.u32 %v2326_v26, %v2294_v31 }
 0x248   : > { %v2414_v42 = vmul.f32 1.25, %v1832_v35  ;;  %v1835_v44 = vadd.f32 %v2835_v29, %v1674_v56  ;;  %v2724_v45 = vpop.f32.mrb[68].mxu0  ;;  %v2836_v46 = vpop.f32.mrb[68].mxu1  ;;  %v2075_v29 = vadd.s32 %v2043_v13, %v3702_v43  ;;  %v2327_v56 = vshrl.u32 %v2295_v47, 16 }
 0x249   : > { %v2725_v49 = vpop.f32.mrb[69].mxu0  ;;  %v2837_v52 = vpop.f32.mrb[69].mxu1  ;;  %v3856_v12 = vxor.u32 %v2141_v39, %v2109_v20  ;;  %vm2390_vm8 = vcmp.lt.u32.totalorder %v3854_v10, 3435973837 }
 0x24a   : > { %v2446_v60 = vsel %vm2382_vm0, %v2414_v42, 0.0  ;;  %v2415_v62 = vmul.f32 1.25, %v1835_v44  ;;  %v2726_v63 = vadd.f32 %v2725_v49, %v2724_v45  ;;  %v2838_v1 = vadd.f32 %v2837_v52, %v2836_v46  ;;  %v2727_v2 = vpop.f32.mrb[70].mxu0  ;;  %v2839_v3 = vpop.f32.mrb[70].mxu1 }
 0x24b   : > { %2478 = vst [vmem:[%s3814_s13] sm:$0xff] %v2446_v60  ;;  %v2728_v7 = vpop.f32.mrb[71].mxu0  ;;  %v2840_v9 = vpop.f32.mrb[71].mxu1  ;;  %v3839_v42 = vxor.u32 %v2234_v18, %v2202_v53  ;;  %v2076_v44 = vadd.s32 %v2044_v21, %v3702_v43  ;;  %v2046_v45 = vmul.u32 128, %v2012_v22  ;;  %v2204_v53 = vmul.u32 2146121005, %v3832_v28 }
 0x24c   : > { %v2447_v14 = vsel %vm2383_vm1, %v2415_v62, 0.0  ;;  %v1679_v15 = vadd.f32 %v2726_v63, %v3775_v8  ;;  %v2729_v16 = vadd.f32 %v2728_v7, %v2727_v2  ;;  %v2841_v17 = vadd.f32 %v2840_v9, %v2839_v3 }
 0x24d   : > { %2479 = vst [vmem:[%s3814_s13 + $0x8] sm:$0xff] %v2447_v14  ;;  %v2235_v63 = vshrl.u32 %v2203_v27, 15  ;;  %v2077_v2 = vadd.s32 %v2045_v30, %v3702_v43  ;;  %v2111_v13 = vxor.u32 %v3710_v54, %v2076_v44  ;;  %v2078_v37 = vadd.s32 %v2046_v45, %v3702_v43 }
 0x24e   : > { %v1840_v24 = vadd.f32 %v2838_v1, %v1679_v15  ;;  %v1682_v25 = vadd.f32 %v2729_v16, %v3775_v8  ;;  %v2110_v1 = vxor.u32 %v3710_v54, %v2075_v29  ;;  %v3863_v4 = vxor.u32 %v2327_v56, %v2295_v47 }
 0x24f   : > { %v2328_v16 = vshrl.u32 %v2296_v38, 16  ;;  %v2236_v11 = vshrl.u32 %v2204_v53, 15  ;;  %v1980_v18 = vadd.s32 160, %v3545_v51  ;;  %v2298_v23 = vmul.u32 2221713035, %v3839_v42 }
 0x250   : > { %v2416_v32 = vmul.f32 1.25, %v1840_v24  ;;  %v1843_v33 = vadd.f32 %v2841_v17, %v1682_v25  ;;  %v2730_v34 = vpop.f32.mrb[72].mxu0  ;;  %v2842_v35 = vpop.f32.mrb[72].mxu1  ;;  %v2142_v31 = vshrl.u32 %v2110_v1, 16  ;;  %v2112_v17 = vxor.u32 %v3710_v54, %v2077_v2 }
 0x251   : > { %v2731_v40 = vpop.f32.mrb[73].mxu0  ;;  %v2843_v41 = vpop.f32.mrb[73].mxu1  ;;  %v3871_v47 = vxor.u32 %v2235_v63, %v2203_v27  ;;  %v2205_v28 = vmul.u32 2146121005, %v3856_v12  ;;  %v2143_v29 = vshrl.u32 %v2111_v13, 16  ;;  %v2113_v30 = vxor.u32 %v3710_v54, %v2078_v37 }
 0x252   : > { %v2448_v46 = vsel %vm2384_vm2, %v2416_v32, 0.0  ;;  %v2417_v49 = vmul.f32 1.25, %v1843_v33  ;;  %v2732_v52 = vadd.f32 %v2731_v40, %v2730_v34  ;;  %v2844_v50 = vadd.f32 %v2843_v41, %v2842_v35  ;;  %v2733_v55 = vpop.f32.mrb[74].mxu0  ;;  %v2845_v0 = vpop.f32.mrb[74].mxu1 }
 0x253   : > { %2480 = vst [vmem:[%s3814_s13 + $0x10] sm:$0xff] %v2448_v46  ;;  %v2734_v60 = vpop.f32.mrb[75].mxu0  ;;  %v2846_v62 = vpop.f32.mrb[75].mxu1  ;;  %v1981_v32 = vadd.s32 168, %v3545_v51  ;;  %v3880_v44 = vxor.u32 %v2236_v11, %v2204_v53  ;;  %v3882_v45 = vxor.u32 %v2142_v31, %v2110_v1  ;;  %v2144_v46 = vshrl.u32 %v2112_v17, 16 }
 0x254   : > { %v2449_v61 = vsel %vm2385_vm3, %v2417_v49, 0.0  ;;  %v1687_v3 = vadd.f32 %v2732_v52, %v3775_v8  ;;  %v2735_v7 = vadd.f32 %v2734_v60, %v2733_v55  ;;  %v2847_v9 = vadd.f32 %v2846_v62, %v2845_v0 }
 0x255   : > { %2481 = vst [vmem:[%s3814_s13 + $0x18] sm:$0xff] %v2449_v61  ;;  %v2013_v49 = vadd.s32 %v3691_v58, %v1980_v18  ;;  %v2299_v0 = vmul.u32 2221713035, %v3871_v47  ;;  %v3890_v60 = vxor.u32 %v2143_v29, %v2111_v13  ;;  %v2145_v62 = vshrl.u32 %v2113_v30, 16 }
 0x256   : > { %v1848_v14 = vadd.f32 %v2844_v50, %v1687_v3  ;;  %v1690_v15 = vadd.f32 %v2735_v7, %v3775_v8  ;;  %v2014_v63 = vadd.s32 %v3691_v58, %v1981_v32  ;;  %v3896_v2 = vxor.u32 %v2328_v16, %v2296_v38 }
 0x257   : > { %v2237_v61 = vshrl.u32 %v2205_v28, 15  ;;  %v2206_v3 = vmul.u32 2146121005, %v3882_v45  ;;  %v3902_v7 = vxor.u32 %v2144_v46, %v2112_v17  ;;  %v2330_v57 = vshrl.u32 %v2298_v23, 16 }
 0x258   : > { %v2418_v20 = vmul.f32 1.25, %v1848_v14  ;;  %v1851_v21 = vadd.f32 %v2847_v9, %v1690_v15  ;;  %v2736_v22 = vpop.f32.mrb[76].mxu0  ;;  %v2848_v24 = vpop.f32.mrb[76].mxu1  ;;  %v2047_v9 = vmul.u32 128, %v2013_v49  ;;  %v2300_v38 = vmul.u32 2221713035, %v3880_v44 }
 0x259   : > { %v2737_v25 = vpop.f32.mrb[77].mxu0  ;;  %v2849_v26 = vpop.f32.mrb[77].mxu1  ;;  %vm2391_vm9 = vcmp.lt.u32.totalorder %v3863_v4, 3435973837  ;;  %v2331_v11 = vshrl.u32 %v2299_v0, 16  ;;  %v3909_v17 = vxor.u32 %v2145_v62, %v2113_v30  ;;  %v2048_v18 = vmul.u32 128, %v2014_v63 }
 0x25a   : > { %v2450_v33 = vsel %vm2386_vm4, %v2418_v20, 0.0  ;;  %v2419_v34 = vmul.f32 1.25, %v1851_v21  ;;  %v2738_v35 = vadd.f32 %v2737_v25, %v2736_v22  ;;  %v2850_v56 = vadd.f32 %v2849_v26, %v2848_v24  ;;  %v2739_v27 = vpop.f32.mrb[78].mxu0  ;;  %v2851_v40 = vpop.f32.mrb[78].mxu1 }
 0x25b   : > { %2482 = vst [vmem:[%s3814_s13 + $0x20] sm:$0xff] %v2450_v33  ;;  %v2740_v41 = vpop.f32.mrb[79].mxu0  ;;  %v2852_v39 = vpop.f32.mrb[79].mxu1  ;;  %v2207_v31 = vmul.u32 2146121005, %v3890_v60  ;;  %v3914_v32 = vxor.u32 %v2237_v61, %v2205_v28  ;;  %v2238_v33 = vshrl.u32 %v2206_v3, 15  ;;  %v2079_v30 = vadd.s32 %v2047_v9, %v3702_v43 }
 0x25c   : > { %v2451_v5 = vsel %vm2387_vm5, %v2419_v34, 0.0  ;;  %v1695_v52 = vadd.f32 %v2738_v35, %v3775_v8  ;;  %v2741_v50 = vadd.f32 %v2740_v41, %v2739_v27  ;;  %v2853_v55 = vadd.f32 %v2852_v39, %v2851_v40 }
 0x25d   : > { %2483 = vst [vmem:[%s3814_s13 + $0x28] sm:$0xff] %v2451_v5  ;;  %v2208_v34 = vmul.u32 2146121005, %v3902_v7  ;;  %v3924_v40 = vxor.u32 %v2329_v6, %v2297_v59  ;;  %v2209_v28 = vmul.u32 2146121005, %v3909_v17  ;;  %v2080_v41 = vadd.s32 %v2048_v18, %v3702_v43 }
 0x25e   : > { %v1856_v53 = vadd.f32 %v2850_v56, %v1695_v52  ;;  %v1698_v1 = vadd.f32 %v2741_v50, %v3775_v8  ;;  %v1982_v39 = vadd.s32 176, %v3545_v51  ;;  %v3932_v36 = vxor.u32 %v2330_v57, %v2298_v23 }
 0x25f   : > { %v3934_v49 = vxor.u32 %v2331_v11, %v2299_v0  ;;  %vm2392_vm10 = vcmp.lt.u32.totalorder %v3896_v2, 3435973837  ;;  %v2301_v48 = vmul.u32 2221713035, %v3914_v32  ;;  %v2239_v59 = vshrl.u32 %v2207_v31, 15 }
 0x260   : > { %v2420_v12 = vmul.f32 1.25, %v1856_v53  ;;  %v1859_v13 = vadd.f32 %v2853_v55, %v1698_v1  ;;  %v2742_v37 = vpop.f32.mrb[80].mxu0  ;;  %v2854_v14 = vpop.f32.mrb[80].mxu1  ;;  %v2240_v5 = vshrl.u32 %v2208_v34, 15  ;;  %v2114_v52 = vxor.u32 %v3710_v54, %v2079_v30 }
 0x261   : > { %v2743_v15 = vpop.f32.mrb[81].mxu0  ;;  %v2855_v16 = vpop.f32.mrb[81].mxu1  ;;  %v2332_v42 = vshrl.u32 %v2300_v38, 16  ;;  %v3941_v23 = vxor.u32 %v2238_v33, %v2206_v3  ;;  %v2241_v53 = vshrl.u32 %v2209_v28, 15  ;;  %v2115_v1 = vxor.u32 %v3710_v54, %v2080_v41 }
 0x262   : > { %v2452_v20 = vsel %vm2388_vm6, %v2420_v12, 0.0  ;;  %v2421_v21 = vmul.f32 1.25, %v1859_v13  ;;  %v2744_v22 = vadd.f32 %v2743_v15, %v2742_v37  ;;  %v2856_v24 = vadd.f32 %v2855_v16, %v2854_v14  ;;  %v2745_v47 = vpop.f32.mrb[82].mxu0  ;;  %v2857_v25 = vpop.f32.mrb[82].mxu1 }
 0x263   : > { %2484 = vst [vmem:[%s3814_s13 + $0x30] sm:$0xff] %v2452_v20  ;;  %v2746_v26 = vpop.f32.mrb[83].mxu0  ;;  %v2858_v29 = vpop.f32.mrb[83].mxu1  ;;  %v2015_v6 = vadd.s32 %v3691_v58, %v1982_v39  ;;  %v1983_v61 = vadd.s32 184, %v3545_v51  ;;  %v2333_v15 = vshrl.u32 %v2301_v48, 16  ;;  %v3949_v16 = vxor.u32 %v2239_v59, %v2207_v31 }
 0x264   : > { %v2453_v19 = vsel %vm2389_vm7, %v2421_v21, 0.0  ;;  %v1703_v35 = vadd.f32 %v2744_v22, %v3775_v8  ;;  %v2747_v56 = vadd.f32 %v2746_v26, %v2745_v47  ;;  %v2859_v27 = vadd.f32 %v2858_v29, %v2857_v25 }
 0x265   : > { %2485 = vst [vmem:[%s3814_s13 + $0x38] sm:$0xff] %v2453_v19  ;;  %v3951_v11 = vxor.u32 %v2240_v5, %v2208_v34  ;;  %v2146_v17 = vshrl.u32 %v2114_v52, 16  ;;  %v3957_v22 = vxor.u32 %v2241_v53, %v2209_v28  ;;  %v2049_v47 = vmul.u32 128, %v2015_v6 }
 0x266   : > { %v1864_v45 = vadd.f32 %v2856_v24, %v1703_v35  ;;  %v1706_v46 = vadd.f32 %v2747_v56, %v3775_v8  ;;  %v2147_v24 = vshrl.u32 %v2115_v1, 16  ;;  %v2016_v25 = vadd.s32 %v3691_v58, %v1983_v61 }
 0x267   : > { %vm2393_vm11 = vcmp.lt.u32.totalorder %v3924_v40, 3435973837  ;;  %v3964_v4 = vxor.u32 %v2332_v42, %v2300_v38  ;;  %vm2394_vm12 = vcmp.lt.u32.totalorder %v3932_v36, 3435973837  ;;  %v2302_v29 = vmul.u32 2221713035, %v3941_v23 }
 0x268   : > { %v2422_v50 = vmul.f32 1.25, %v1864_v45  ;;  %v1867_v55 = vadd.f32 %v2859_v27, %v1706_v46  ;;  %v2748_v60 = vpop.f32.mrb[84].mxu0  ;;  %v2860_v62 = vpop.f32.mrb[84].mxu1  ;;  %v2303_v32 = vmul.u32 2221713035, %v3949_v16  ;;  %v3969_v33 = vxor.u32 %v2146_v17, %v2114_v52 }
 0x269   : > { %v2749_v0 = vpop.f32.mrb[85].mxu0  ;;  %v2861_v63 = vpop.f32.mrb[85].mxu1  ;;  %v1984_v34 = vadd.s32 192, %v3545_v51  ;;  %v3972_v27 = vxor.u32 %v2333_v15, %v2301_v48  ;;  %v2304_v44 = vmul.u32 2221713035, %v3951_v11  ;;  %v3977_v39 = vxor.u32 %v2147_v24, %v2115_v1 }
 0x26a   : > { %v2454_v7 = vsel %vm2390_vm8, %v2422_v50, 0.0  ;;  %v2423_v9 = vmul.f32 1.25, %v1867_v55  ;;  %v2750_v12 = vadd.f32 %v2749_v0, %v2748_v60  ;;  %v2862_v13 = vadd.f32 %v2861_v63, %v2860_v62  ;;  %v2751_v37 = vpop.f32.mrb[86].mxu0  ;;  %v2863_v14 = vpop.f32.mrb[86].mxu1 }
 0x26b   : > { %2486 = vst [vmem:[%s3814_s13 + $0x40] sm:$0xff] %v2454_v7  ;;  %v2752_v3 = vpop.f32.mrb[87].mxu0  ;;  %v2864_v57 = vpop.f32.mrb[87].mxu1  ;;  %vm2395_vm13 = vcmp.lt.u32.totalorder %v3934_v49, 3435973837  ;;  %v2081_v45 = vadd.s32 %v2049_v47, %v3702_v43  ;;  %v2050_v46 = vmul.u32 128, %v2016_v25  ;;  %v2017_v0 = vadd.s32 %v3691_v58, %v1984_v34 }
 0x26c   : > { %v2455_v18 = vsel %vm2391_vm9, %v2423_v9, 0.0  ;;  %v1711_v10 = vadd.f32 %v2750_v12, %v3775_v8  ;;  %v2753_v20 = vadd.f32 %v2752_v3, %v2751_v37  ;;  %v2865_v21 = vadd.f32 %v2864_v57, %v2863_v14 }
 0x26d   : > { %2487 = vst [vmem:[%s3814_s13 + $0x48] sm:$0xff] %v2455_v18  ;;  %v2305_v41 = vmul.u32 2221713035, %v3957_v22  ;;  %v2210_v42 = vmul.u32 2146121005, %v3969_v33  ;;  %v1985_v63 = vadd.s32 200, %v3545_v51  ;;  %v2116_v9 = vxor.u32 %v3710_v54, %v2081_v45 }
 0x26e   : > { %v1872_v26 = vadd.f32 %v2862_v13, %v1711_v10  ;;  %v1714_v31 = vadd.f32 %v2753_v20, %v3775_v8  ;;  %v1986_v53 = vadd.s32 208, %v3545_v51  ;;  %v2211_v7 = vmul.u32 2146121005, %v3977_v39 }
 0x26f   : > { %v2082_v12 = vadd.s32 %v2050_v46, %v3702_v43  ;;  %v1987_v13 = vadd.s32 216, %v3545_v51  ;;  %v2334_v40 = vshrl.u32 %v2302_v29, 16  ;;  %v2335_v3 = vshrl.u32 %v2303_v32, 16 }
 0x270   : > { %v2424_v30 = vmul.f32 1.25, %v1872_v26  ;;  %v1875_v19 = vadd.f32 %v2865_v21, %v1714_v31  ;;  %v2754_v35 = vpop.f32.mrb[88].mxu0  ;;  %v2866_v56 = vpop.f32.mrb[88].mxu1  ;;  %vm2396_vm14 = vcmp.lt.u32.totalorder %v3964_v4, 3435973837  ;;  %v2242_v57 = vshrl.u32 %v2210_v42, 15 }
 0x271   : > { %v2755_v38 = vpop.f32.mrb[89].mxu0  ;;  %v2867_v28 = vpop.f32.mrb[89].mxu1  ;;  %v2051_v15 = vmul.u32 128, %v2017_v0  ;;  %v2018_v17 = vadd.s32 %v3691_v58, %v1985_v63  ;;  %v2019_v18 = vadd.s32 %v3691_v58, %v1986_v53  ;;  %v2336_v47 = vshrl.u32 %v2304_v44, 16 }
 0x272   : > { %v2456_v59 = vsel %vm2392_vm10, %v2424_v30, 0.0  ;;  %v2425_v5 = vmul.f32 1.25, %v1875_v19  ;;  %v2756_v48 = vadd.f32 %v2755_v38, %v2754_v35  ;;  %v2868_v52 = vadd.f32 %v2867_v28, %v2866_v56  ;;  %v2757_v50 = vpop.f32.mrb[90].mxu0  ;;  %v2869_v55 = vpop.f32.mrb[90].mxu1 }
 0x273   : > { %2488 = vst [vmem:[%s3814_s13 + $0x50] sm:$0xff] %v2456_v59  ;;  %v2758_v60 = vpop.f32.mrb[91].mxu0  ;;  %v2870_v62 = vpop.f32.mrb[91].mxu1  ;;  %v2337_v25 = vshrl.u32 %v2305_v41, 16  ;;  %vm2397_vm15 = vcmp.lt.u32.totalorder %v3972_v27, 3435973837  ;;  %v2117_v30 = vxor.u32 %v3710_v54, %v2082_v12  ;;  %v2020_v19 = vadd.s32 %v3691_v58, %v1987_v13 }
 0x274   : > { %v2457_v2 = vsel %vm2393_vm11, %v2425_v5, 0.0  ;;  %v1719_v1 = vadd.f32 %v2756_v48, %v3775_v8  ;;  %v2759_v6 = vadd.f32 %v2758_v60, %v2757_v50  ;;  %v2871_v61 = vadd.f32 %v2870_v62, %v2869_v55 }
 0x275   : > { %2489 = vst [vmem:[%s3814_s13 + $0x58] sm:$0xff] %v2457_v2  ;;  %v2243_v33 = vshrl.u32 %v2211_v7, 15  ;;  %v2148_v34 = vshrl.u32 %v2116_v9, 16  ;;  %v4013_v5 = vxor.u32 %v2242_v57, %v2210_v42  ;;  %v2083_v48 = vadd.s32 %v2051_v15, %v3702_v43 }
 0x276   : > { %v1880_v37 = vadd.f32 %v2868_v52, %v1719_v1  ;;  %v1722_v14 = vadd.f32 %v2759_v6, %v3775_v8  ;;  %v2052_v52 = vmul.u32 128, %v2018_v17  ;;  %v2053_v50 = vmul.u32 128, %v2019_v18 }
 0x277   : > { %v4020_v0 = vxor.u32 %v2243_v33, %v2211_v7  ;;  %v4022_v63 = vxor.u32 %v2148_v34, %v2116_v9  ;;  %v2149_v53 = vshrl.u32 %v2117_v30, 16  ;;  %v2054_v2 = vmul.u32 128, %v2020_v19 }
 0x278   : > { %v2426_v10 = vmul.f32 1.25, %v1880_v37  ;;  %v1883_v20 = vadd.f32 %v2871_v61, %v1722_v14  ;;  %v2760_v21 = vpop.f32.mrb[92].mxu0  ;;  %v2872_v24 = vpop.f32.mrb[92].mxu1  ;;  %v4027_v6 = vxor.u32 %v2334_v40, %v2302_v29  ;;  %v4031_v49 = vxor.u32 %v2335_v3, %v2303_v32 }
 0x279   : > { %v2761_v26 = vpop.f32.mrb[93].mxu0  ;;  %v2873_v31 = vpop.f32.mrb[93].mxu1  ;;  %v4035_v61 = vxor.u32 %v2336_v47, %v2304_v44  ;;  %v2118_v7 = vxor.u32 %v3710_v54, %v2083_v48  ;;  %v2084_v9 = vadd.s32 %v2052_v52, %v3702_v43  ;;  %v2085_v12 = vadd.s32 %v2053_v50, %v3702_v43 }
 0x27a   : > { %v2458_v35 = vsel %vm2394_vm12, %v2426_v10, 0.0  ;;  %v2427_v56 = vmul.f32 1.25, %v1883_v20  ;;  %v2762_v38 = vadd.f32 %v2761_v26, %v2760_v21  ;;  %v2874_v28 = vadd.f32 %v2873_v31, %v2872_v24  ;;  %v2763_v39 = vpop.f32.mrb[94].mxu0  ;;  %v2875_v45 = vpop.f32.mrb[94].mxu1 }
 0x27b   : > { %2490 = vst [vmem:[%s3814_s13 + $0x60] sm:$0xff] %v2458_v35  ;;  %v2764_v46 = vpop.f32.mrb[95].mxu0  ;;  %v2876_v59 = vpop.f32.mrb[95].mxu1  ;;  %v4042_v16 = vxor.u32 %v2337_v25, %v2305_v41  ;;  %v2306_v29 = vmul.u32 2221713035, %v4013_v5  ;;  %v4047_v3 = vxor.u32 %v2149_v53, %v2117_v30  ;;  %v2086_v57 = vadd.s32 %v2054_v2, %v3702_v43 }
 0x27c   : > { %v2459_v55 = vsel %vm2395_vm13, %v2427_v56, 0.0  ;;  %v1727_v36 = vadd.f32 %v2762_v38, %v3775_v8  ;;  %v2765_v60 = vadd.f32 %v2764_v46, %v2763_v39  ;;  %v2877_v62 = vadd.f32 %v2876_v59, %v2875_v45 }
 0x27d   : > { %2491 = vst [vmem:[%s3814_s13 + $0x68] sm:$0xff] %v2459_v55  ;;  %v2307_v44 = vmul.u32 2221713035, %v4020_v0  ;;  %v2212_v40 = vmul.u32 2146121005, %v4022_v63  ;;  %v2150_v24 = vshrl.u32 %v2118_v7, 16  ;;  %v2119_v47 = vxor.u32 %v3710_v54, %v2084_v9 }
 0x27e   : > { %v1888_v42 = vadd.f32 %v2874_v28, %v1727_v36  ;;  %v1730_v1 = vadd.f32 %v2765_v60, %v3775_v8  ;;  %v2120_v25 = vxor.u32 %v3710_v54, %v2085_v12  ;;  %v1988_v26 = vadd.s32 224, %v3545_v51 }
 0x27f   : > { %v2244_v30 = vshrl.u32 %v2212_v40, 15  ;;  %v2213_v19 = vmul.u32 2146121005, %v4047_v3  ;;  %v2121_v35 = vxor.u32 %v3710_v54, %v2086_v57  ;;  %v1989_v56 = vadd.s32 232, %v3545_v51 }
 0x280   : > { %v2428_v13 = vmul.f32 1.25, %v1888_v42  ;;  %v1891_v37 = vadd.f32 %v2877_v62, %v1730_v1  ;;  %v2766_v14 = vpop.f32.mrb[96].mxu0  ;;  %v2878_v23 = vpop.f32.mrb[96].mxu1  ;;  %vm2398_vm0 = vcmp.lt.u32.totalorder %v4027_v6, 3435973837  ;;  %v2338_v27 = vshrl.u32 %v2306_v29, 16 }
 0x281   : > { %v2767_v11 = vpop.f32.mrb[97].mxu0  ;;  %v2879_v32 = vpop.f32.mrb[97].mxu1  ;;  %vm2399_vm1 = vcmp.lt.u32.totalorder %v4031_v49, 3435973837  ;;  %vm2400_vm2 = vcmp.lt.u32.totalorder %v4035_v61, 3435973837  ;;  %v4069_v39 = vxor.u32 %v2150_v24, %v2118_v7  ;;  %v2021_v46 = vadd.s32 %v3691_v58, %v1988_v26 }
 0x282   : > { %v2460_v15 = vsel %vm2396_vm14, %v2428_v13, 0.0  ;;  %v2429_v17 = vmul.f32 1.25, %v1891_v37  ;;  %v2768_v22 = vadd.f32 %v2767_v11, %v2766_v14  ;;  %v2880_v41 = vadd.f32 %v2879_v32, %v2878_v23  ;;  %v2769_v18 = vpop.f32.mrb[98].mxu0  ;;  %v2881_v10 = vpop.f32.mrb[98].mxu1 }
 0x283   : > { %2492 = vst [vmem:[%s3814_s13 + $0x70] sm:$0xff] %v2460_v15  ;;  %v2770_v20 = vpop.f32.mrb[99].mxu0  ;;  %v2882_v21 = vpop.f32.mrb[99].mxu1  ;;  %v2151_v45 = vshrl.u32 %v2119_v47, 16  ;;  %v2339_v55 = vshrl.u32 %v2307_v44, 16  ;;  %v2152_v36 = vshrl.u32 %v2120_v25, 16  ;;  %v4075_v63 = vxor.u32 %v2244_v30, %v2212_v40 }
 0x284   : > { %v2461_v4 = vsel %vm2397_vm15, %v2429_v17, 0.0  ;;  %v1735_v31 = vadd.f32 %v2768_v22, %v3775_v8  ;;  %v2771_v33 = vadd.f32 %v2770_v20, %v2769_v18  ;;  %v2883_v34 = vadd.f32 %v2882_v21, %v2881_v10 }
 0x285   : > { %2493 = vst [vmem:[%s3814_s13 + $0x78] sm:$0xff] %v2461_v4  ;;  %vm2401_vm3 = vcmp.lt.u32.totalorder %v4042_v16, 3435973837  ;;  %v2245_v53 = vshrl.u32 %v2213_v19, 15  ;;  %v2153_v2 = vshrl.u32 %v2121_v35, 16  ;;  %v2022_v42 = vadd.s32 %v3691_v58, %v1989_v56 }
 0x286   : > { %v1896_v38 = vadd.f32 %v2880_v41, %v1735_v31  ;;  %v1738_v28 = vadd.f32 %v2771_v33, %v3775_v8  ;;  %v2214_v11 = vmul.u32 2146121005, %v4069_v39  ;;  %v4082_v32 = vxor.u32 %v2151_v45, %v2119_v47 }
 0x287   : > { %v2055_v40 = vmul.u32 128, %v2021_v46  ;;  %v1990_v3 = vadd.s32 240, %v3545_v51  ;;  %v2308_v22 = vmul.u32 2221713035, %v4075_v63  ;;  %v4090_v41 = vxor.u32 %v2152_v36, %v2120_v25 }
 0x288   : > { %v2430_v59 = vmul.f32 1.25, %v1896_v38  ;;  %v1899_v48 = vadd.f32 %v2883_v34, %v1738_v28  ;;  %v2772_v52 = vpop.f32.mrb[100].mxu0  ;;  %v2884_v50 = vpop.f32.mrb[100].mxu1  ;;  %v2056_v18 = vmul.u32 128, %v2022_v42  ;;  %v1991_v10 = vadd.s32 248, %v3545_v51 }
 0x289   : > { %v2773_v60 = vpop.f32.mrb[101].mxu0  ;;  %v2885_v62 = vpop.f32.mrb[101].mxu1  ;;  %v2370_v24 = vxor.u32 %v2338_v27, %v2306_v29  ;;  %v4098_v49 = vxor.u32 %v2339_v55, %v2307_v44  ;;  %v4100_v47 = vxor.u32 %v2245_v53, %v2213_v19  ;;  %v2215_v26 = vmul.u32 2146121005, %v4082_v32 }
 0x28a   : > { %v2462_v1 = vsel %vm2398_vm0, %v2430_v59, 0.0  ;;  %v2431_v7 = vmul.f32 1.25, %v1899_v48  ;;  %v2774_v9 = vadd.f32 %v2773_v60, %v2772_v52  ;;  %v2886_v12 = vadd.f32 %v2885_v62, %v2884_v50  ;;  %v2775_v13 = vpop.f32.mrb[102].mxu0  ;;  %v2887_v37 = vpop.f32.mrb[102].mxu1 }
 0x28b   : > { %2494 = vst [vmem:[%s3814_s13 + $0x80] sm:$0xff] %v2462_v1  ;;  %v2776_v14 = vpop.f32.mrb[103].mxu0  ;;  %v2888_v23 = vpop.f32.mrb[103].mxu1  ;;  %v2087_v25 = vadd.s32 %v2055_v40, %v3702_v43  ;;  %v2023_v4 = vadd.s32 %v3691_v58, %v1990_v3  ;;  %v2246_v30 = vshrl.u32 %v2214_v11, 15  ;;  %v4105_v5 = vxor.u32 %v2153_v2, %v2121_v35 }
 0x28c   : > { %v2463_v6 = vsel %vm2399_vm1, %v2431_v7, 0.0  ;;  %v1743_v57 = vadd.f32 %v2774_v9, %v3775_v8  ;;  %v2777_v15 = vadd.f32 %v2776_v14, %v2775_v13  ;;  %v2889_v17 = vadd.f32 %v2888_v23, %v2887_v37 }
 0x28d   : > { %2495 = vst [vmem:[%s3814_s13 + $0x88] sm:$0xff] %v2463_v6  ;;  %v2340_v44 = vshrl.u32 %v2308_v22, 16  ;;  %v2216_v19 = vmul.u32 2146121005, %v4090_v41  ;;  %v2088_v56 = vadd.s32 %v2056_v18, %v3702_v43  ;;  %v2024_v38 = vadd.s32 %v3691_v58, %v1991_v10 }
 0x28e   : > { %v1904_v20 = vadd.f32 %v2886_v12, %v1743_v57  ;;  %v1746_v21 = vadd.f32 %v2777_v15, %v3775_v8  ;;  %v2309_v52 = vmul.u32 2221713035, %v4100_v47  ;;  %v2247_v50 = vshrl.u32 %v2215_v26, 15 }
 0x28f   : > { %v2122_v55 = vxor.u32 %v3710_v54, %v2087_v25  ;;  %v2057_v36 = vmul.u32 128, %v2023_v4  ;;  %v4119_v63 = vxor.u32 %v2246_v30, %v2214_v11  ;;  %v2217_v53 = vmul.u32 2146121005, %v4105_v5 }
 0x290   : > { %v2432_v31 = vmul.f32 1.25, %v1904_v20  ;;  %v1907_v51 = vadd.f32 %v2889_v17, %v1746_v21  ;;  %v2778_v33 = vpop.f32.mrb[104].mxu0  ;;  %v2890_v34 = vpop.f32.mrb[104].mxu1  ;;  %v2123_v2 = vxor.u32 %v3710_v54, %v2088_v56  ;;  %v2058_v42 = vmul.u32 128, %v2024_v38 }
 0x291   : > { %v2779_v29 = vpop.f32.mrb[105].mxu0  ;;  %v2891_v0 = vpop.f32.mrb[105].mxu1  ;;  %vm2402_vm4 = vcmp.lt.u32.totalorder %v2370_v24, 3435973837  ;;  %vm2403_vm5 = vcmp.lt.u32.totalorder %v4098_v49, 3435973837  ;;  %v2089_v13 = vadd.s32 %v2057_v36, %v3702_v43  ;;  %v2372_v32 = vxor.u32 %v2340_v44, %v2308_v22 }
 0x292   : > { %v2464_v28 = vsel %vm2400_vm2, %v2432_v31, 0.0  ;;  %v2433_v27 = vmul.f32 1.25, %v1907_v51  ;;  %v2780_v39 = vadd.f32 %v2779_v29, %v2778_v33  ;;  %v2892_v45 = vadd.f32 %v2891_v0, %v2890_v34  ;;  %v2781_v46 = vpop.f32.mrb[106].mxu0  ;;  %v2893_v59 = vpop.f32.mrb[106].mxu1 }
 0x293   : > { %2496 = vst [vmem:[%s3814_s13 + $0x90] sm:$0xff] %v2464_v28  ;;  %v2782_v35 = vpop.f32.mrb[107].mxu0  ;;  %v2894_v48 = vpop.f32.mrb[107].mxu1  ;;  %v2341_v16 = vshrl.u32 %v2309_v52, 16  ;;  %v2248_v9 = vshrl.u32 %v2216_v19, 15  ;;  %v2154_v12 = vshrl.u32 %v2122_v55, 16  ;;  %v4126_v40 = vxor.u32 %v2247_v50, %v2215_v26 }
 0x294   : > { %v2465_v58 = vsel %vm2401_vm3, %v2433_v27, 0.0  ;;  %v1751_v61 = vadd.f32 %v2780_v39, %v3775_v8  ;;  %v2783_v60 = vadd.f32 %v2782_v35, %v2781_v46  ;;  %v2895_v62 = vadd.f32 %v2894_v48, %v2893_v59 }
 0x295   : > { %2497 = vst [vmem:[%s3814_s13 + $0x98] sm:$0xff] %v2465_v58  ;;  %v2310_v57 = vmul.u32 2221713035, %v4119_v63  ;;  %v2249_v15 = vshrl.u32 %v2217_v53, 15  ;;  %v2155_v17 = vshrl.u32 %v2123_v2, 16  ;;  %v2090_v41 = vadd.s32 %v2058_v42, %v3702_v43 }
 0x296   : > { %v1912_v1 = vadd.f32 %v2892_v45, %v1751_v61  ;;  %v1754_v7 = vadd.f32 %v2783_v60, %v3775_v8  ;;  %v2373_v4 = vxor.u32 %v2341_v16, %v2309_v52  ;;  %v4132_v31 = vxor.u32 %v2248_v9, %v2216_v19  ;;  %v4152_v16 = vld [vmem:[%s4229_s5] ss:$0 sm:$0xff] }
 0x297   : > { %v2186_v51 = vxor.u32 %v2154_v12, %v2122_v55  ;;  %v2124_v33 = vxor.u32 %v3710_v54, %v2089_v13  ;;  %v2311_v5 = vmul.u32 2221713035, %v4126_v40  ;;  %v2187_v29 = vxor.u32 %v2155_v17, %v2123_v2 }
 0x298   : > { %v2434_v37 = vmul.f32 1.25, %v1912_v1  ;;  %v1915_v14 = vadd.f32 %v2895_v62, %v1754_v7  ;;  %v2784_v23 = vpop.f32.mrb[108].mxu0  ;;  %v2896_v11 = vpop.f32.mrb[108].mxu1  ;;  %v2125_v0 = vxor.u32 %v3710_v54, %v2090_v41  ;;  %vm2404_vm6 = vcmp.lt.u32.totalorder %v2372_v32, 3435973837 }
 0x299   : > { %v2785_v3 = vpop.f32.mrb[109].mxu0  ;;  %v2897_v6 = vpop.f32.mrb[109].mxu1  ;;  %v4142_v56 = vxor.u32 %v2249_v15, %v2217_v53  ;;  %v2342_v38 = vshrl.u32 %v2310_v57, 16  ;;  %v2312_v49 = vmul.u32 2221713035, %v4132_v31  ;;  %v2156_v27 = vshrl.u32 %v2124_v33, 16 }
 0x29a   : > { %v2466_v18 = vsel %vm2402_vm4, %v2434_v37, 0.0  ;;  %v2435_v10 = vmul.f32 1.25, %v1915_v14  ;;  %v2786_v20 = vadd.f32 %v2785_v3, %v2784_v23  ;;  %v2898_v21 = vadd.f32 %v2897_v6, %v2896_v11  ;;  %v2787_v47 = vpop.f32.mrb[110].mxu0  ;;  %v2899_v25 = vpop.f32.mrb[110].mxu1 }
 0x29b   : > { %2498 = vst [vmem:[%s3814_s13 + $0xa0] sm:$0xff] %v2466_v18  ;;  %v2788_v22 = vpop.f32.mrb[111].mxu0  ;;  %v2900_v26 = vpop.f32.mrb[111].mxu1  ;;  %v2218_v28 = vmul.u32 2146121005, %v2186_v51  ;;  %v2343_v54 = vshrl.u32 %v2311_v5, 16  ;;  %v2374_v62 = vxor.u32 %v2342_v38, %v2310_v57  ;;  %v2188_v1 = vxor.u32 %v2156_v27, %v2124_v33 }
 0x29c   : > { %v2467_v43 = vsel %vm2403_vm5, %v2435_v10, 0.0  ;;  %v1759_v24 = vadd.f32 %v2786_v20, %v3775_v8  ;;  %v2789_v34 = vadd.f32 %v2788_v22, %v2787_v47  ;;  %v2901_v30 = vadd.f32 %v2900_v26, %v2899_v25 }
 0x29d   : > { %2499 = vst [vmem:[%s3814_s13 + $0xa8] sm:$0xff] %v2467_v43  ;;  %vm2405_vm7 = vcmp.lt.u32.totalorder %v2373_v4, 3435973837  ;;  %v2219_v52 = vmul.u32 2146121005, %v2187_v29  ;;  %v2157_v50 = vshrl.u32 %v2125_v0, 16  ;;  %v2375_v37 = vxor.u32 %v2343_v54, %v2311_v5 }
 0x29e   : > { %v1920_v44 = vadd.f32 %v2898_v21, %v1759_v24  ;;  %v1762_v19 = vadd.f32 %v2789_v34, %v3775_v8  ;;  %v2313_v2 = vmul.u32 2221713035, %v4142_v56  ;;  %v2250_v42 = vshrl.u32 %v2218_v28, 15 }
 0x29f   : > { %v2251_v14 = vshrl.u32 %v2219_v52, 15  ;;  %v2189_v23 = vxor.u32 %v2157_v50, %v2125_v0  ;;  %vm2406_vm8 = vcmp.lt.u32.totalorder %v2374_v62, 3435973837  ;;  %v2344_v40 = vshrl.u32 %v2312_v49, 16 }
 0x2a0   : > { %v2436_v39 = vmul.f32 1.25, %v1920_v44  ;;  %v1923_v45 = vadd.f32 %v2901_v30, %v1762_v19  ;;  %v2790_v46 = vpop.f32.mrb[112].mxu0  ;;  %v2902_v59 = vpop.f32.mrb[112].mxu1  ;;  %v2282_v3 = vxor.u32 %v2250_v42, %v2218_v28  ;;  %v2220_v6 = vmul.u32 2146121005, %v2188_v1 }
 0x2a1   : > { %v2791_v35 = vpop.f32.mrb[113].mxu0  ;;  %v2903_v48 = vpop.f32.mrb[113].mxu1  ;;  %v2345_v18 = vshrl.u32 %v2313_v2, 16  ;;  %vm2407_vm9 = vcmp.lt.u32.totalorder %v2375_v37, 3435973837  ;;  %v2283_v21 = vxor.u32 %v2251_v14, %v2219_v52  ;;  %v2376_v33 = vxor.u32 %v2344_v40, %v2312_v49 }
 0x2a2   : > { %v2468_v8 = vsel %vm2404_vm6, %v2436_v39, 0.0  ;;  %v2437_v55 = vmul.f32 1.25, %v1923_v45  ;;  %v2792_v36 = vadd.f32 %v2791_v35, %v2790_v46  ;;  %v2904_v58 = vadd.f32 %v2903_v48, %v2902_v59  ;;  %v2793_v61 = vpop.f32.mrb[114].mxu0  ;;  %v2905_v60 = vpop.f32.mrb[114].mxu1 }
 0x2a3   : > { %2500 = vst [vmem:[%s3814_s13 + $0xb0] sm:$0xff] %v2468_v8  ;;  %v2794_v63 = vpop.f32.mrb[115].mxu0  ;;  %v2906_v53 = vpop.f32.mrb[115].mxu1  ;;  %v2221_v47 = vmul.u32 2146121005, %v2189_v23  ;;  %v2252_v30 = vshrl.u32 %v2220_v6, 15  ;;  %v2377_v19 = vxor.u32 %v2345_v18, %v2313_v2 }
 0x2a4   : > { %v2469_v7 = vsel %vm2405_vm7, %v2437_v55, 0.0  ;;  %v1767_v9 = vadd.f32 %v4152_v16, %v2792_v36  ;;  %v2795_v12 = vadd.f32 %v2794_v63, %v2793_v61  ;;  %v2907_v13 = vadd.f32 %v2906_v53, %v2905_v60 }
 0x2a5   : > { %2501 = vst [vmem:[%s3814_s13 + $0xb8] sm:$0xff] %v2469_v7  ;;  %v2314_v34 = vmul.u32 2221713035, %v2282_v3  ;;  %v2315_v56 = vmul.u32 2221713035, %v2283_v21  ;;  %v2253_v38 = vshrl.u32 %v2221_v47, 15  ;;  %v2284_v49 = vxor.u32 %v2252_v30, %v2220_v6 }
 0x2a6   : > { %v1928_v11 = vadd.f32 %v2904_v58, %v1767_v9  ;;  %v1770_v32 = vadd.f32 %v4152_v16, %v2795_v12  ;;  %vm2408_vm10 = vcmp.lt.u32.totalorder %v2376_v33, 3435973837  ;;  %vm2409_vm11 = vcmp.lt.u32.totalorder %v2377_v19, 3435973837 }
 0x2a7   : > { %v2346_v39 = vshrl.u32 %v2314_v34, 16  ;;  %v2347_v52 = vshrl.u32 %v2315_v56, 16  ;;  %v2285_v50 = vxor.u32 %v2253_v38, %v2221_v47  ;;  %v2316_v2 = vmul.u32 2221713035, %v2284_v49 }
 0x2a8   : > { %v2438_v57 = vmul.f32 1.25, %v1928_v11  ;;  %v1931_v15 = vadd.f32 %v2907_v13, %v1770_v32  ;;  %v2796_v17 = vpop.f32.mrb[116].mxu0  ;;  %v2908_v41 = vpop.f32.mrb[116].mxu1 }
 0x2a9   : > { %v2797_v10 = vpop.f32.mrb[117].mxu0  ;;  %v2909_v20 = vpop.f32.mrb[117].mxu1  ;;  %v2378_v62 = vxor.u32 %v2346_v39, %v2314_v34  ;;  %v2379_v12 = vxor.u32 %v2347_v52, %v2315_v56  ;;  %v2317_v13 = vmul.u32 2221713035, %v2285_v50  ;;  %v2348_v23 = vshrl.u32 %v2316_v2, 16 }
 0x2aa   : > { %v2470_v25 = vsel %vm2406_vm8, %v2438_v57, 0.0  ;;  %v2439_v22 = vmul.f32 1.25, %v1931_v15  ;;  %v2798_v26 = vadd.f32 %v2797_v10, %v2796_v17  ;;  %v2910_v4 = vadd.f32 %v2909_v20, %v2908_v41  ;;  %v2799_v31 = vpop.f32.mrb[118].mxu0  ;;  %v2911_v51 = vpop.f32.mrb[118].mxu1 }
 0x2ab   : > { %2502 = vst [vmem:[%s3814_s13 + $0xc0] sm:$0xff] %v2470_v25  ;;  %v2800_v43 = vpop.f32.mrb[119].mxu0  ;;  %v2912_v24 = vpop.f32.mrb[119].mxu1  ;;  %vm2410_vm12 = vcmp.lt.u32.totalorder %v2378_v62, 3435973837  ;;  %v2349_v15 = vshrl.u32 %v2317_v13, 16  ;;  %v2380_v47 = vxor.u32 %v2348_v23, %v2316_v2 }
 0x2ac   : > { %v2471_v5 = vsel %vm2407_vm9, %v2439_v22, 0.0  ;;  %v1775_v29 = vadd.f32 %v4152_v16, %v2798_v26  ;;  %v2801_v0 = vadd.f32 %v2800_v43, %v2799_v31  ;;  %v2913_v44 = vadd.f32 %v2912_v24, %v2911_v51 }
 0x2ad   : > { %2503 = vst [vmem:[%s3814_s13 + $0xc8] sm:$0xff] %v2471_v5  ;;  %vm2411_vm13 = vcmp.lt.u32.totalorder %v2379_v12, 3435973837  ;;  %v2381_v33 = vxor.u32 %v2349_v15, %v2317_v13  ;;  %vm2412_vm14 = vcmp.lt.u32.totalorder %v2380_v47, 3435973837 }
 0x2ae   : > { %v1936_v28 = vadd.f32 %v2910_v4, %v1775_v29  ;;  %v1778_v27 = vadd.f32 %v4152_v16, %v2801_v0 }
 0x2af   : > { %vm2413_vm15 = vcmp.lt.u32.totalorder %v2381_v33, 3435973837 }
 0x2b0   : > { %v2440_v45 = vmul.f32 1.25, %v1936_v28  ;;  %v1939_v46 = vadd.f32 %v2913_v44, %v1778_v27  ;;  %v2802_v59 = vpop.f32.mrb[120].mxu0  ;;  %v2914_v35 = vpop.f32.mrb[120].mxu1 }
 0x2b1   : > { %v2803_v48 = vpop.f32.mrb[121].mxu0  ;;  %v2915_v54 = vpop.f32.mrb[121].mxu1 }
 0x2b2   : > { %v2472_v8 = vsel %vm2408_vm10, %v2440_v45, 0.0  ;;  %v2441_v55 = vmul.f32 1.25, %v1939_v46  ;;  %v2804_v36 = vadd.f32 %v2803_v48, %v2802_v59  ;;  %v2916_v58 = vadd.f32 %v2915_v54, %v2914_v35  ;;  %v2805_v61 = vpop.f32.mrb[122].mxu0  ;;  %v2917_v60 = vpop.f32.mrb[122].mxu1 }
 0x2b3   : > { %2504 = vst [vmem:[%s3814_s13 + $0xd0] sm:$0xff] %v2472_v8  ;;  %v2806_v63 = vpop.f32.mrb[123].mxu0  ;;  %v2918_v53 = vpop.f32.mrb[123].mxu1 }
 0x2b4   : > { %v2473_v42 = vsel %vm2409_vm11, %v2441_v55, 0.0  ;;  %v1783_v1 = vadd.f32 %v4152_v16, %v2804_v36  ;;  %v2807_v7 = vadd.f32 %v2806_v63, %v2805_v61  ;;  %v2919_v9 = vadd.f32 %v2918_v53, %v2917_v60 }
 0x2b5   : > { %2505 = vst [vmem:[%s3814_s13 + $0xd8] sm:$0xff] %v2473_v42 }
 0x2b6   : > { %v1944_v37 = vadd.f32 %v2916_v58, %v1783_v1  ;;  %v1786_v14 = vadd.f32 %v4152_v16, %v2807_v7 }
 0x2b8   : > { %v2442_v11 = vmul.f32 1.25, %v1944_v37  ;;  %v1947_v32 = vadd.f32 %v2919_v9, %v1786_v14  ;;  %v2808_v40 = vpop.f32.mrb[124].mxu0  ;;  %v2920_v3 = vpop.f32.mrb[124].mxu1 }
 0x2b9   : > { %v2809_v6 = vpop.f32.mrb[125].mxu0  ;;  %v2921_v57 = vpop.f32.mrb[125].mxu1 }
 0x2ba   : > { %v2474_v17 = vsel %vm2410_vm12, %v2442_v11, 0.0  ;;  %v2443_v41 = vmul.f32 1.25, %v1947_v32  ;;  %v2810_v18 = vadd.f32 %v2809_v6, %v2808_v40  ;;  %v2922_v10 = vadd.f32 %v2921_v57, %v2920_v3  ;;  %v2811_v20 = vpop.f32.mrb[126].mxu0  ;;  %v2923_v21 = vpop.f32.mrb[126].mxu1 }
 0x2bb   : > { %2506 = vst [vmem:[%s3814_s13 + $0xe0] sm:$0xff] %v2474_v17  ;;  %v2812_v25 = vpop.f32.mrb[127].mxu0  ;;  %v2924_v22 = vpop.f32.mrb[127].mxu1 }
 0x2bc   : > { %v2475_v26 = vsel %vm2411_vm13, %v2443_v41, 0.0  ;;  %v1791_v4 = vadd.f32 %v4152_v16, %v2810_v18  ;;  %v2813_v31 = vadd.f32 %v2812_v25, %v2811_v20  ;;  %v2925_v51 = vadd.f32 %v2924_v22, %v2923_v21 }
 0x2bd   : > { %2507 = vst [vmem:[%s3814_s13 + $0xe8] sm:$0xff] %v2475_v26 }
 0x2be   : > { %v1952_v43 = vadd.f32 %v2922_v10, %v1791_v4  ;;  %v1794_v24 = vadd.f32 %v4152_v16, %v2813_v31 }
 0x2c0   : > { %v2444_v34 = vmul.f32 1.25, %v1952_v43  ;;  %v1955_v30 = vadd.f32 %v2925_v51, %v1794_v24 }
 0x2c2   : > { %v2476_v5 = vsel %vm2412_vm14, %v2444_v34, 0.0  ;;  %v2445_v29 = vmul.f32 1.25, %v1955_v30 }
 0x2c3   : > { %2508 = vst [vmem:[%s3814_s13 + $0xf0] sm:$0xff] %v2476_v5 }
 0x2c4   : > { %v2477_v16 = vsel %vm2413_vm15, %v2445_v29, 0.0 }
 0x2c5   : > { %2509 = vst [vmem:[%s3814_s13 + $0xf8] sm:$0xff] %v2477_v16 }
 0x2c6   : > { %3182 = shalt.err (!%p3179_p2)
}
 0x2c7   : > { %s3183_s17 = scalar_lea.hbm %s4176_s11, 4096  ;;  %s3187_s13 = scalar_lea.hbm %s4230_s6, 8192 }
 0x2c8   : > { %p3184_p13 = scmp.ne.s32.totalorder %s4176_s11, %s3183_s17  ;;  %p3188_p4 = scmp.lt.u32.totalorder %s4176_s11, %s4230_s6 }
 0x2c9   : > { %p3189_p7 = scmp.lt.u32.totalorder %s3187_s13, %s3183_s17  ;;  %p3191_p11 = scmp.lt.u32.totalorder %s3183_s17, %s4176_s11 }
 0x2ca   : > { %p3185_p6 = pnand %p3184_p13, %p4244_p0 }
 0x2cb   : > { %p3190_p8 = por %p3189_p7, %p3188_p4 }
 0x2cc   : > { %p3186_p10 = pneg %p3185_p6 }
 0x2cd   : > { %p3192_p1 = por %p3191_p11, %p3190_p8 }
 0x2cf   : > { %p3193_p3 = pnand %p3192_p1, %p3186_p10 }
 0x2d1   : > { %3196 = shalt.err (!%p3193_p3)
}
 0x2d2   : > { %s3252_s19 = smov 128   ;;  %s3253_s27 = smov 8  }
 0x2d3   : > { %2936 = dma.vmem_to_hbm [thread:$0]  (%p4244_p0), %s4178_s20, 4096, %s4176_s11, %s2511_s0, %s3252_s19, %s3252_s19, %s3253_s27  }
 0x2d4 PF: > { %s2539_s12 = sand.u32 1, %s3227_s23   ;;  %p4245_p5 = scmp.ne.s32.totalorder %s4235_s29, 0 }
 0x2d5   : > { %p4246_p9 = scmp.ge.s32.totalorder %s3239_s26, 2  ;;  %s2540_s28 = scalar_lea.sflag [#allocation7], %s2539_s12 }
 0x2d7   : > { %p2950_p12 = pnand %p4246_p9, %p4245_p5 }
 0x2d9   : > { %3222 = dma.done.wait (!%p2950_p12), %s2540_s28, 4096  }
 0x2da   : > { %3224 = vsyncadd (!%p2950_p12), %s2540_s28, 4294963200  ;;  %p21_p2 = scmp.ge.s32.totalorder %s3402_s21, 4   ;;  %s4247_s23 = smov %s3231_s24 }
 0x2db   : > { %s4248_s24 = smov %s3235_s25  ;;  %s4249_s25 = smov %s3411_s7 }
 0x2dc   : > { %s4250_s26 = smov %s3402_s21  ;;  %23 = sbr.rel (!%p21_p2) target bundleno = 8 (0x8), region = 93 }
 0x2e3   :  { %2545 = vsyncpa [#allocation6], 1 }
 0x2e4   :  { %2547 = vsyncpa [#allocation6 + $0x1], 1 }
 0x2e5   :  { %2548 = vsyncpa [#allocation9], 1 }
 0x2e6   :  { %2549 = vsyncpa [#allocation7], 1 }
 0x2e7   :  { %2551 = vsyncpa [#allocation7 + $0x1], 1 }

</bundles_post_ra>
